<compile_context>
chip_gen: v7x
topology: tpu7x:2x2x1
jax: 0.10.0
libtpu: 0.0.40
codegen_flags: <defaults>
</compile_context>

<pallas_src>
import functools

import jax
import jax.numpy as jnp
from jax.experimental import pallas as pl
from jax.experimental.pallas import tpu as pltpu

LANE = 128  # lane width; pad channel dims to multiples of this


# ----------------------------- small helpers ---------------------------------

def _round_up(x, m):
    return (x + m - 1) // m * m


def _tile_rows(M, target=512):
    """Pick a row-tile size and padded row count. Prefer >=2 grid steps."""
    tm = min(target, _round_up(M, 8))
    m_pad = _round_up(M, tm)
    if m_pad // tm == 1 and tm >= 512:
        tm //= 2
        m_pad = _round_up(M, tm)
    return tm, m_pad


def _pad_rows(x, rows):
    return x if x.shape[0] == rows else jnp.pad(x, ((0, rows - x.shape[0]), (0, 0)))


def _pad2(w, r, c):
    return jnp.pad(w, ((0, r - w.shape[0]), (0, c - w.shape[1])))


def _pad_vec(v, c):
    return jnp.pad(v, (0, c - v.shape[0])).reshape(1, c)


# ----------------------------- in-kernel math ---------------------------------

def _mish(x):
    # mish(x) = x * tanh(softplus(x)).  With t = 1 + e^x:
    #   tanh(softplus(x)) = 1 - 2/(t^2 + 1)
    # rewritten with e = exp(-|x|) (never overflows) so only ONE exp is needed;
    # the divide goes to the EUP as an approximate reciprocal.
    e = jnp.exp(-jnp.abs(x))
    pos = x >= 0
    num = jnp.where(pos, 2.0 * e * e, 2.0)
    den = jnp.where(pos, 1.0 + 2.0 * e + 2.0 * e * e, 2.0 + 2.0 * e + e * e)
    return x - x * num * pl.reciprocal(den, approx=True)


# ------------------------------- Pallas kernels --------------------------------

def _head_kernel(x_ref, w1_ref, b1_ref, w2_ref, b2_ref, x0_ref, x2_ref):
    """Fused cv1 (1x1 conv + Mish) and cv2 (1x1 conv): one x load, two outputs."""
    x = x_ref[...]                                                     # bf16 (tm, C1p)
    y1 = jnp.dot(x, w1_ref[...], preferred_element_type=jnp.float32) + b1_ref[...]
    x0_ref[...] = _mish(y1).astype(x0_ref.dtype)
    y2 = jnp.dot(x, w2_ref[...], preferred_element_type=jnp.float32) + b2_ref[...]
    x2_ref[...] = y2.astype(x2_ref.dtype)                              # no activation


def _bottleneck_kernel(x_ref, w1_ref, b1_ref, w2_ref, b2_ref, o_ref,
                       ypad_ref, acc_ref, *, H, W, use_add):
    """One fused Bottleneck (per image): 1x1+Mish -> in-kernel 3x3+Mish (+shortcut)."""
    Cp = x_ref.shape[-1]
    x = x_ref[0].reshape(H * W, Cp)                                    # bf16 (HW, Cp)

    # cv1: 1x1 conv + Mish
    y = jnp.dot(x, w1_ref[...], preferred_element_type=jnp.float32) + b1_ref[...]
    y = _mish(y)

    # write cv1 output into a zero halo-padded VMEM buffer (pad=1 for the 3x3)
    ypad_ref[...] = jnp.zeros_like(ypad_ref)
    ypad_ref[1:H + 1, 1:W + 1, :] = y.reshape(H, W, Cp).astype(ypad_ref.dtype)

    # cv2: 3x3 conv as 9 shifted-window matmuls accumulated in f32 (no im2col)
    acc_ref[...] = jnp.zeros_like(acc_ref)
    for t in range(9):
        dy, dx = t // 3, t % 3
        patch = ypad_ref[dy:dy + H, dx:dx + W, :].reshape(H * W, Cp)
        acc_ref[...] += jnp.dot(patch, w2_ref[t], preferred_element_type=jnp.float32)

    z = _mish(acc_ref[...] + b2_ref[...])
    if use_add:
        z = z + x.astype(jnp.float32)                                  # shortcut
    o_ref[...] = z.reshape(1, H, W, Cp).astype(o_ref.dtype)


def _tail_kernel(x1_ref, x2_ref, w3_ref, b3_ref,
                 bnw1_ref, bnb1_ref, bnw2_ref, bnb2_ref,
                 w4a_ref, w4b_ref, b4_ref, o_ref):
    """Fused cv3 (1x1) + concat + Affine2d + Mish + cv4 (1x1) + Mish."""
    # cv3 on the bottleneck-branch output
    h1 = jnp.dot(x1_ref[...], w3_ref[...], preferred_element_type=jnp.float32) + b3_ref[...]
    # Affine2d + Mish per concat-half (concat itself never materialized)
    a1 = _mish(h1 * bnw1_ref[...] + bnb1_ref[...])
    a2 = _mish(x2_ref[...].astype(jnp.float32) * bnw2_ref[...] + bnb2_ref[...])
    # cv4: split weight rows so cat([a1, a2]) @ W == a1 @ Wa + a2 @ Wb
    y = (jnp.dot(a1.astype(jnp.bfloat16), w4a_ref[...], preferred_element_type=jnp.float32)
         + jnp.dot(a2.astype(jnp.bfloat16), w4b_ref[...], preferred_element_type=jnp.float32)
         + b4_ref[...])
    o_ref[...] = _mish(y).astype(o_ref.dtype)


# ------------------------------ kernel wrappers --------------------------------

def csp_head(xf, w1, b1, w2, b2, *, tm):
    M, K = xf.shape
    Cp = w1.shape[1]
    grid = (M // tm,)
    cost = pl.CostEstimate(
        flops=4 * M * K * Cp,
        transcendentals=M * Cp,
        bytes_accessed=(M * K + 2 * K * Cp + 2 * M * Cp) * 2 + 2 * Cp * 4)
    return pl.pallas_call(
        _head_kernel,
        grid=grid,
        in_specs=[
            pl.BlockSpec((tm, K), lambda i: (i, 0)),
            pl.BlockSpec((K, Cp), lambda i: (0, 0)),
            pl.BlockSpec((1, Cp), lambda i: (0, 0)),
            pl.BlockSpec((K, Cp), lambda i: (0, 0)),
            pl.BlockSpec((1, Cp), lambda i: (0, 0)),
        ],
        out_specs=(pl.BlockSpec((tm, Cp), lambda i: (i, 0)),
                   pl.BlockSpec((tm, Cp), lambda i: (i, 0))),
        out_shape=(jax.ShapeDtypeStruct((M, Cp), jnp.bfloat16),
                   jax.ShapeDtypeStruct((M, Cp), jnp.bfloat16)),
        compiler_params=pltpu.CompilerParams(dimension_semantics=("parallel",)),
        cost_estimate=cost,
    )(xf, w1, b1, w2, b2)


def bottleneck_block(x_img, w1, b1, w2, b2, *, use_add):
    N, H, W, Cp = x_img.shape
    M = N * H * W
    cost = pl.CostEstimate(
        flops=20 * M * Cp * Cp,
        transcendentals=2 * M * Cp,
        bytes_accessed=(2 * M * Cp + 10 * Cp * Cp) * 2)
    kern = functools.partial(_bottleneck_kernel, H=H, W=W, use_add=bool(use_add))
    return pl.pallas_call(
        kern,
        grid=(N,),
        in_specs=[
            pl.BlockSpec((1, H, W, Cp), lambda n: (n, 0, 0, 0)),
            pl.BlockSpec((Cp, Cp), lambda n: (0, 0)),
            pl.BlockSpec((1, Cp), lambda n: (0, 0)),
            pl.BlockSpec((9, Cp, Cp), lambda n: (0, 0, 0)),
            pl.BlockSpec((1, Cp), lambda n: (0, 0)),
        ],
        out_specs=pl.BlockSpec((1, H, W, Cp), lambda n: (n, 0, 0, 0)),
        out_shape=jax.ShapeDtypeStruct((N, H, W, Cp), jnp.bfloat16),
        scratch_shapes=[
            pltpu.VMEM((H + 2, W + 2, Cp), jnp.bfloat16),   # halo-padded cv1 output
            pltpu.VMEM((H * W, Cp), jnp.float32),           # 3x3 f32 accumulator
        ],
        compiler_params=pltpu.CompilerParams(dimension_semantics=("parallel",)),
        cost_estimate=cost,
    )(x_img, w1, b1, w2, b2)


def csp_tail(x1, x2, w3, b3, bnw1, bnb1, bnw2, bnb2, w4a, w4b, b4, *, tm):
    M, Cp = x1.shape
    C2p = w4a.shape[1]
    cost = pl.CostEstimate(
        flops=2 * M * Cp * Cp + 4 * M * Cp * C2p,
        transcendentals=M * (2 * Cp + C2p),
        bytes_accessed=(2 * M * Cp + Cp * Cp + 2 * Cp * C2p) * 2 + M * C2p * 4)
    return pl.pallas_call(
        _tail_kernel,
        grid=(M // tm,),
        in_specs=[
            pl.BlockSpec((tm, Cp), lambda i: (i, 0)),
            pl.BlockSpec((tm, Cp), lambda i: (i, 0)),
            pl.BlockSpec((Cp, Cp), lambda i: (0, 0)),
            pl.BlockSpec((1, Cp), lambda i: (0, 0)),
            pl.BlockSpec((1, Cp), lambda i: (0, 0)),
            pl.BlockSpec((1, Cp), lambda i: (0, 0)),
            pl.BlockSpec((1, Cp), lambda i: (0, 0)),
            pl.BlockSpec((1, Cp), lambda i: (0, 0)),
            pl.BlockSpec((Cp, C2p), lambda i: (0, 0)),
            pl.BlockSpec((Cp, C2p), lambda i: (0, 0)),
            pl.BlockSpec((1, C2p), lambda i: (0, 0)),
        ],
        out_specs=pl.BlockSpec((tm, C2p), lambda i: (i, 0)),
        out_shape=jax.ShapeDtypeStruct((M, C2p), jnp.float32),
        compiler_params=pltpu.CompilerParams(dimension_semantics=("parallel",)),
        cost_estimate=cost,
    )(x1, x2, w3, b3, bnw1, bnb1, bnw2, bnb2, w4a, w4b, b4)


# ------------------------------ parameters ------------------------------------

def init_params(key, c1, c2, n=1, shortcut=True, g=1, e=0.5):
    if g != 1:
        raise NotImplementedError("g>1")  # TODO(synk): grouped 3x3 conv (g>1) not implemented
    c_ = int(c2 * e)
    ks = iter(jax.random.split(key, 8 + 4 * n))

    def w1(k, cin, cout):   # 1x1 conv weight, (Cin, Cout)
        return 0.3 * jax.random.normal(k, (cin, cout), jnp.float32)

    def w3(k, cin, cout):   # 3x3 conv weight, (3, 3, Cin, Cout)
        return 0.2 * jax.random.normal(k, (3, 3, cin, cout), jnp.float32)

    def bias(k, c):
        return 0.05 * jax.random.normal(k, (c,), jnp.float32)

    params = {
        "cv1_w": w1(next(ks), c1, c_),     "cv1_b": bias(next(ks), c_),
        "cv2_w": w1(next(ks), c1, c_),     "cv2_b": bias(next(ks), c_),
        "cv3_w": w1(next(ks), c_, c_),     "cv3_b": bias(next(ks), c_),
        "cv4_w": w1(next(ks), 2 * c_, c2), "cv4_b": bias(next(ks), c2),
        "bn_w": jnp.ones((2 * c_,), jnp.float32),    # Affine2d init: ones
        "bn_b": jnp.zeros((2 * c_,), jnp.float32),   # Affine2d init: zeros
        "use_add": bool(shortcut),                   # Bottleneck(c_, c_): c1 == c2
        "m": [],
    }
    for _ in range(n):
        params["m"].append({
            "cv1_w": w1(next(ks), c_, c_), "cv1_b": bias(next(ks), c_),
            "cv2_w": w3(next(ks), c_, c_), "cv2_b": bias(next(ks), c_),
        })
    return params


def prepare_params(params, c1):
    """Zero-pad channels to lane multiples and cast matmul operands to bf16."""
    c_ = params["cv1_w"].shape[1]
    c2 = params["cv4_w"].shape[1]
    C1p, Cp, C2p = _round_up(c1, LANE), _round_up(c_, LANE), _round_up(c2, LANE)
    bf = jnp.bfloat16
    pp = {
        "cv1_w": _pad2(params["cv1_w"], C1p, Cp).astype(bf),
        "cv1_b": _pad_vec(params["cv1_b"], Cp),
        "cv2_w": _pad2(params["cv2_w"], C1p, Cp).astype(bf),
        "cv2_b": _pad_vec(params["cv2_b"], Cp),
        "cv3_w": _pad2(params["cv3_w"], Cp, Cp).astype(bf),
        "cv3_b": _pad_vec(params["cv3_b"], Cp),
        "cv4_wa": _pad2(params["cv4_w"][:c_], Cp, C2p).astype(bf),
        "cv4_wb": _pad2(params["cv4_w"][c_:], Cp, C2p).astype(bf),
        "cv4_b": _pad_vec(params["cv4_b"], C2p),
        "bn_w1": _pad_vec(params["bn_w"][:c_], Cp),
        "bn_b1": _pad_vec(params["bn_b"][:c_], Cp),
        "bn_w2": _pad_vec(params["bn_w"][c_:], Cp),
        "bn_b2": _pad_vec(params["bn_b"][c_:], Cp),
        "m": [],
    }
    for blk in params["m"]:
        w3x3 = jnp.pad(blk["cv2_w"], ((0, 0), (0, 0), (0, Cp - c_), (0, Cp - c_)))
        pp["m"].append({
            "cv1_w": _pad2(blk["cv1_w"], Cp, Cp).astype(bf),
            "cv1_b": _pad_vec(blk["cv1_b"], Cp),
            "cv2_w": w3x3.reshape(9, Cp, Cp).astype(bf),   # tap-major (ky*3+kx, Cin, Cout)
            "cv2_b": _pad_vec(blk["cv2_b"], Cp),
        })
    return pp


# --------------------------------- forward ------------------------------------

def bottleneck_csp_forward(params, x_nchw, *, tile_m=512):
    N, c1, H, W = x_nchw.shape
    M = N * H * W
    c2 = params["cv4_w"].shape[1]
    pp = prepare_params(params, c1)
    C1p = pp["cv1_w"].shape[0]
    Cp = pp["cv1_w"].shape[1]

    # NCHW -> NHWC -> (M, C1p) bf16, channel- and row-padded for lane-dense tiles
    x = jnp.transpose(x_nchw, (0, 2, 3, 1)).astype(jnp.float32).reshape(M, c1)
    xf = jnp.pad(x, ((0, 0), (0, C1p - c1))).astype(jnp.bfloat16)
    tm, m_pad = _tile_rows(M, tile_m)
    xf = _pad_rows(xf, m_pad)

    # fused cv1 (1x1 + Mish) and cv2 (1x1): one pass over x, two outputs
    x0, x2 = csp_head(xf, pp["cv1_w"], pp["cv1_b"], pp["cv2_w"], pp["cv2_b"], tm=tm)

    # n fused Bottleneck blocks (in-kernel 3x3, no HBM im2col)
    x1_img = x0[:M].reshape(N, H, W, Cp)
    for blk in pp["m"]:
        x1_img = bottleneck_block(x1_img, blk["cv1_w"], blk["cv1_b"],
                                  blk["cv2_w"], blk["cv2_b"],
                                  use_add=params["use_add"])

    # fused cv3 + concat + Affine2d + Mish + cv4 + Mish
    x1 = _pad_rows(x1_img.reshape(M, Cp), m_pad)
    out = csp_tail(x1, x2, pp["cv3_w"], pp["cv3_b"],
                   pp["bn_w1"], pp["bn_b1"], pp["bn_w2"], pp["bn_b2"],
                   pp["cv4_wa"], pp["cv4_wb"], pp["cv4_b"], tm=tm)

    out = out[:M, :c2].reshape(N, H, W, c2)
    return jnp.transpose(out, (0, 3, 1, 2))                            # back to NCHW


# ------------------------------------ main -------------------------------------

if __name__ == "__main__":
    key = jax.random.PRNGKey(0)
    kx, kp = jax.random.split(key)

    c1, c2, n = 4, 4, 1
    x = jax.random.normal(kx, (2, c1, 16, 16), jnp.float32)   # NCHW like PyTorch
    params = init_params(kp, c1, c2, n=n, shortcut=True, g=1, e=0.5)

    out = bottleneck_csp_forward(params, x)
    out = jax.block_until_ready(out)

    assert out.shape == (2, c2, 16, 16), out.shape
    assert bool(jnp.all(jnp.isfinite(out)))
    print("KERNEL_OK")
</pallas_src>

<mosaic_0001>
module attributes {stable_mosaic.version = 11 : i64} {
  func.func @_head_kernel(%arg0: i32, %arg1: memref<256x128xbf16, #tpu.memory_space<vmem>>, %arg2: memref<128x128xbf16, #tpu.memory_space<vmem>>, %arg3: memref<1x128xf32, #tpu.memory_space<vmem>>, %arg4: memref<128x128xbf16, #tpu.memory_space<vmem>>, %arg5: memref<1x128xf32, #tpu.memory_space<vmem>>, %arg6: memref<256x128xbf16, #tpu.memory_space<vmem>>, %arg7: memref<256x128xbf16, #tpu.memory_space<vmem>>) attributes {dimension_semantics = [#tpu.dimension_semantics<parallel>], iteration_bounds = array<i64: 2>, scalar_prefetch = 0 : i64, scratch_operands = 0 : i64, tpu.core_type = #tpu.core_type<tc>, window_params = [{transform_indices = @transform_0, window_bounds = array<i64: 256, 128>}, {pipeline_mode = #tpu.pipeline_mode<synchronous>, transform_indices = @transform_1, window_bounds = array<i64: 128, 128>}, {pipeline_mode = #tpu.pipeline_mode<synchronous>, transform_indices = @transform_2, window_bounds = array<i64: 1, 128>}, {pipeline_mode = #tpu.pipeline_mode<synchronous>, transform_indices = @transform_3, window_bounds = array<i64: 128, 128>}, {pipeline_mode = #tpu.pipeline_mode<synchronous>, transform_indices = @transform_4, window_bounds = array<i64: 1, 128>}, {transform_indices = @transform_5, window_bounds = array<i64: 256, 128>}, {transform_indices = @transform_6, window_bounds = array<i64: 256, 128>}]} {
    %c0 = arith.constant 0 : index
    %c0_0 = arith.constant 0 : index
    %0 = vector.load %arg1[%c0, %c0_0] : memref<256x128xbf16, #tpu.memory_space<vmem>>, vector<256x128xbf16>
    %c0_1 = arith.constant 0 : index
    %c0_2 = arith.constant 0 : index
    %1 = vector.load %arg2[%c0_1, %c0_2] : memref<128x128xbf16, #tpu.memory_space<vmem>>, vector<128x128xbf16>
    %cst = arith.constant dense<0.000000e+00> : vector<256x128xf32>
    %2 = tpu.matmul %0, %1, %cst {dimension_numbers = #tpu.dot_dimension_numbers<[1], [0], [0], [1], [0, 0, 1, 1], [], []>} : vector<256x128xbf16>, vector<128x128xbf16>, vector<256x128xf32> -> vector<256x128xf32>
    %c0_3 = arith.constant 0 : index
    %c0_4 = arith.constant 0 : index
    %3 = vector.load %arg3[%c0_3, %c0_4] : memref<1x128xf32, #tpu.memory_space<vmem>>, vector<1x128xf32>
    %4 = vector.broadcast %3 : vector<1x128xf32> to vector<256x128xf32>
    %5 = arith.addf %2, %4 : vector<256x128xf32>
    %6 = math.absf %5 : vector<256x128xf32>
    %cst_5 = arith.constant 0.000000e+00 : f32
    %7 = vector.broadcast %cst_5 : f32 to vector<256x128xf32>
    %8 = arith.subf %7, %6 : vector<256x128xf32>
    %9 = math.exp %8 : vector<256x128xf32>
    %cst_6 = arith.constant 0.000000e+00 : f32
    %10 = vector.broadcast %cst_6 : f32 to vector<256x128xf32>
    %11 = arith.cmpf oge, %5, %10 : vector<256x128xf32>
    %cst_7 = arith.constant 2.000000e+00 : f32
    %12 = vector.broadcast %cst_7 : f32 to vector<256x128xf32>
    %13 = arith.mulf %12, %9 : vector<256x128xf32>
    %14 = arith.mulf %13, %9 : vector<256x128xf32>
    %cst_8 = arith.constant 2.000000e+00 : f32
    %15 = vector.broadcast %cst_8 : f32 to vector<256x128xf32>
    %16 = arith.select %11, %14, %15 : vector<256x128xi1>, vector<256x128xf32>
    %cst_9 = arith.constant 2.000000e+00 : f32
    %17 = vector.broadcast %cst_9 : f32 to vector<256x128xf32>
    %18 = arith.mulf %17, %9 : vector<256x128xf32>
    %cst_10 = arith.constant 1.000000e+00 : f32
    %19 = vector.broadcast %cst_10 : f32 to vector<256x128xf32>
    %20 = arith.addf %19, %18 : vector<256x128xf32>
    %cst_11 = arith.constant 2.000000e+00 : f32
    %21 = vector.broadcast %cst_11 : f32 to vector<256x128xf32>
    %22 = arith.mulf %21, %9 : vector<256x128xf32>
    %23 = arith.mulf %22, %9 : vector<256x128xf32>
    %24 = arith.addf %20, %23 : vector<256x128xf32>
    %cst_12 = arith.constant 2.000000e+00 : f32
    %25 = vector.broadcast %cst_12 : f32 to vector<256x128xf32>
    %26 = arith.mulf %25, %9 : vector<256x128xf32>
    %cst_13 = arith.constant 2.000000e+00 : f32
    %27 = vector.broadcast %cst_13 : f32 to vector<256x128xf32>
    %28 = arith.addf %27, %26 : vector<256x128xf32>
    %29 = arith.mulf %9, %9 : vector<256x128xf32>
    %30 = arith.addf %28, %29 : vector<256x128xf32>
    %31 = arith.select %11, %24, %30 : vector<256x128xi1>, vector<256x128xf32>
    %32 = arith.mulf %5, %16 : vector<256x128xf32>
    %33 = tpu.reciprocal %31 {approx = true} : vector<256x128xf32> -> vector<256x128xf32>
    %34 = arith.mulf %32, %33 : vector<256x128xf32>
    %35 = arith.subf %5, %34 : vector<256x128xf32>
    %36 = arith.truncf %35 : vector<256x128xf32> to vector<256x128xbf16>
    %c0_14 = arith.constant 0 : index
    %c0_15 = arith.constant 0 : index
    %37 = vector.load %arg6[%c0_14, %c0_15] : memref<256x128xbf16, #tpu.memory_space<vmem>>, vector<256x128xbf16>
    tpu.vector_store %arg6[%c0_14, %c0_15], %36 {strides = array<i32>} : memref<256x128xbf16, #tpu.memory_space<vmem>>, vector<256x128xbf16>,
    %c0_16 = arith.constant 0 : index
    %c0_17 = arith.constant 0 : index
    %38 = vector.load %arg4[%c0_16, %c0_17] : memref<128x128xbf16, #tpu.memory_space<vmem>>, vector<128x128xbf16>
    %cst_18 = arith.constant dense<0.000000e+00> : vector<256x128xf32>
    %39 = tpu.matmul %0, %38, %cst_18 {dimension_numbers = #tpu.dot_dimension_numbers<[1], [0], [0], [1], [0, 0, 1, 1], [], []>} : vector<256x128xbf16>, vector<128x128xbf16>, vector<256x128xf32> -> vector<256x128xf32>
    %c0_19 = arith.constant 0 : index
    %c0_20 = arith.constant 0 : index
    %40 = vector.load %arg5[%c0_19, %c0_20] : memref<1x128xf32, #tpu.memory_space<vmem>>, vector<1x128xf32>
    %41 = vector.broadcast %40 : vector<1x128xf32> to vector<256x128xf32>
    %42 = arith.addf %39, %41 : vector<256x128xf32>
    %43 = arith.truncf %42 : vector<256x128xf32> to vector<256x128xbf16>
    %c0_21 = arith.constant 0 : index
    %c0_22 = arith.constant 0 : index
    %44 = vector.load %arg7[%c0_21, %c0_22] : memref<256x128xbf16, #tpu.memory_space<vmem>>, vector<256x128xbf16>
    tpu.vector_store %arg7[%c0_21, %c0_22], %43 {strides = array<i32>} : memref<256x128xbf16, #tpu.memory_space<vmem>>, vector<256x128xbf16>,
    return
  }
  func.func @transform_0(%arg0: i32) -> (i32, i32) {
    %c0_i32 = arith.constant 0 : i32
    %c0_i32_0 = arith.constant 0 : i32
    return %arg0, %c0_i32 : i32, i32
  }
  func.func @transform_1(%arg0: i32) -> (i32, i32) {
    %c0_i32 = arith.constant 0 : i32
    %c0_i32_0 = arith.constant 0 : i32
    %c0_i32_1 = arith.constant 0 : i32
    return %c0_i32, %c0_i32_0 : i32, i32
  }
  func.func @transform_2(%arg0: i32) -> (i32, i32) {
    %c0_i32 = arith.constant 0 : i32
    %c0_i32_0 = arith.constant 0 : i32
    %c0_i32_1 = arith.constant 0 : i32
    return %c0_i32, %c0_i32_0 : i32, i32
  }
  func.func @transform_3(%arg0: i32) -> (i32, i32) {
    %c0_i32 = arith.constant 0 : i32
    %c0_i32_0 = arith.constant 0 : i32
    %c0_i32_1 = arith.constant 0 : i32
    return %c0_i32, %c0_i32_0 : i32, i32
  }
  func.func @transform_4(%arg0: i32) -> (i32, i32) {
    %c0_i32 = arith.constant 0 : i32
    %c0_i32_0 = arith.constant 0 : i32
    %c0_i32_1 = arith.constant 0 : i32
    return %c0_i32, %c0_i32_0 : i32, i32
  }
  func.func @transform_5(%arg0: i32) -> (i32, i32) {
    %c0_i32 = arith.constant 0 : i32
    %c0_i32_0 = arith.constant 0 : i32
    return %arg0, %c0_i32 : i32, i32
  }
  func.func @transform_6(%arg0: i32) -> (i32, i32) {
    %c0_i32 = arith.constant 0 : i32
    %c0_i32_0 = arith.constant 0 : i32
    return %arg0, %c0_i32 : i32, i32
  }
}

</mosaic_0001>

<bundles_post_ra>
// kernel: tpu_custom_call.1
= control target key start
LH: loop header
LB: loop body
LE: loop exit
PB: predicated region body
PF: predicated region fallthrough
CT: control target
= control target key end

     0   :  { %12 = vsyncpa [#allocation3], 0  ;;  %s3874_s0 = inlined_call_operand.hbm [shape: bf16[512,128], index: 0, kind: input, shape index: {}]   ;;  %s3875_s1 = inlined_call_operand.hbm [shape: bf16[128,128], index: 1, kind: input, shape index: {}]   ;;  %s3876_s2 = inlined_call_operand.vmem [shape: f32[1,128], index: 2, kind: input, shape index: {}]   ;;  %s3877_s3 = inlined_call_operand.hbm [shape: bf16[128,128], index: 3, kind: input, shape index: {}]   ;;  %s3878_s4 = inlined_call_operand.vmem [shape: f32[1,128], index: 4, kind: input, shape index: {}]   ;;  %s3879_s5 = inlined_call_operand.hbm [shape: bf16[512,128], index: 5, kind: output, shape index: {0}]   ;;  %s3880_s6 = inlined_call_operand.hbm [shape: bf16[512,128], index: 6, kind: output, shape index: {1}]  }
   0x1   :  { %14 = vsyncpa [#allocation3 + $0x1], 0 }
   0x2   :  { %15 = vsyncpa [#allocation6], 0 }
   0x3   :  { %16 = vsyncpa [#allocation4], 0 }
   0x4   :  { %18 = vsyncpa [#allocation4 + $0x1], 0 }
   0x5   :  { %19 = vsyncpa [#allocation10], 0 }
   0x6   :  { %21 = vsyncpa [#allocation10 + $0x1], 0  ;;  %s2954_s21 = smov 0   ;;  %s2956_s22 = smov 0  }
   0x7   :  { %s2958_s23 = smov 0   ;;  %s2960_s24 = smov 0  }
   0x8 LB: > { %s2975_s25 = sadd.s32 4294967295, %s2908_s24   ;;  %s1961_s26 = sadd.s32 4294967294, %s2908_s24   ;;  %s2908_s24 = sphi %s2960_s24, %s3935_s24   ;;  %s2904_s23 = sphi %s2958_s23, %s3934_s23   ;;  %s2900_s22 = sphi %s2956_s22, %s3933_s22   ;;  %s2896_s21 = sphi %s2954_s21, %s3932_s21  }
   0x9   : > { %p47_p0 = scmp.ne.s32.totalorder %s2900_s22, %s2896_s21  ;;  %p3881_p1 = scmp.eq.s32.totalorder %s2975_s25, 0 }
   0xa   : > { %p161_p3 = scmp.eq.s32.totalorder %s1961_s26, 1  ;;  %p1962_p5 = scmp.ge.s32.totalorder %s2908_s24, 1 }
   0xb   : > { %p2984_p4 = por %p3881_p1, %p47_p0  ;;  %p194_p7 = scmp.lt.s32.totalorder %s2908_s24, 3 }
   0xc   : > { %p2989_p6 = por %p161_p3, %p47_p0  ;;  %s2910_s30 = smov [#allocation5]  }
   0xd   : > { %s3884_s27 = scalar_select %p2984_p4, 1, 0 }
   0xe   : > { %s3885_s28 = scalar_select %p2989_p6, 1, 0 }
   0xf   : > { %p2994_p8 = pnand %p1962_p5, %p194_p7  ;;  %s206_s7 = sshll.u32 %s2910_s30, 4  ;;  %s2998_s7 = int_to_ptr.vmem [resolvable:$true] %s206_s7 }
  0x10   : > { %s2911_s9 = smov [#allocation7]   ;;  %s2720_s13 = scalar_lea.hbm %s3875_s1, 1024 }
  0x11   : > { %p2496_p9 = pneg %p2994_p8  ;;  %s222_s10 = sshll.u32 %s2911_s9, 4  ;;  %s3009_s10 = int_to_ptr.vmem [resolvable:$true] %s222_s10 }
  0x12   : > { %p2721_p12 = scmp.ne.s32.totalorder %s3875_s1, %s2720_s13  ;;  %p2727_p5 = scmp.lt.u32.totalorder %s2720_s13, %s3875_s1 }
  0x13   : > { %p3005_p11 = pnand %p2496_p9, %p3881_p1 }
  0x15   : > { %p2722_p13 = pneg %p3005_p11 }
  0x17   : > { %p2723_p0 = pnand %p2722_p13, %p2721_p12 }
  0x19   : > { %p2724_p3 = pneg %p2723_p0 }
  0x1b   : > { %p2729_p7 = pnand %p2727_p5, %p2724_p3 }
  0x1d   : > { %2732 = shalt.err (!%p2729_p7)
}
  0x1e   : > { %s2733_s18 = scalar_lea.vmem %s2998_s7, 1024  ;;  %p2741_p2 = scmp.lt.s32.totalorder %s2998_s7, %s2998_s7 }
  0x1f   : > { %p2734_p9 = scmp.ne.s32.totalorder %s2998_s7, %s2733_s18  ;;  %p2742_p12 = scmp.lt.s32.totalorder %s2733_s18, %s2733_s18 }
  0x21   : > { %p2736_p10 = pnand %p2734_p9, %p2722_p13  ;;  %p2743_p0 = por %p2742_p12, %p2741_p2 }
  0x23   : > { %p2737_p1 = pneg %p2736_p10 }
  0x25   : > { %p2744_p6 = pnand %p2743_p0, %p2737_p1 }
  0x27   : > { %2747 = shalt.err (!%p2744_p6)
}
  0x28   : > { %s2912_s19 = smov 64   ;;  %s2913_s20 = smov 4  }
  0x29   : > { %2499 = dma.hbm_to_vmem [thread:$0]  (!%p3005_p11), %s3875_s1, 1024, %s2998_s7, [#allocation6], %s2912_s19, %s2912_s19, %s2913_s20  }
  0x2a   : > { %s2748_s12 = scalar_lea.hbm %s3877_s3, 1024 }
  0x2b   : > { %p2749_p1 = scmp.ne.s32.totalorder %s3877_s3, %s2748_s12  ;;  %p2755_p10 = scmp.lt.u32.totalorder %s2748_s12, %s3877_s3 }
  0x2d   : > { %p2751_p2 = pnand %p2749_p1, %p2722_p13 }
  0x2f   : > { %p2752_p6 = pneg %p2751_p2 }
  0x31   : > { %p2757_p3 = pnand %p2755_p10, %p2752_p6 }
  0x33   : > { %2760 = shalt.err (!%p2757_p3)
}
  0x34   : > { %s2761_s7 = scalar_lea.vmem %s3009_s10, 1024  ;;  %p2769_p12 = scmp.lt.s32.totalorder %s3009_s10, %s3009_s10 }
  0x35   : > { %p2762_p5 = scmp.ne.s32.totalorder %s3009_s10, %s2761_s7  ;;  %p2770_p0 = scmp.lt.s32.totalorder %s2761_s7, %s2761_s7 }
  0x37   : > { %p2764_p7 = pnand %p2762_p5, %p2722_p13  ;;  %p2771_p1 = por %p2770_p0, %p2769_p12 }
  0x39   : > { %p2765_p9 = pneg %p2764_p7 }
  0x3b   : > { %p2772_p2 = pnand %p2771_p1, %p2765_p9 }
  0x3d   : > { %2775 = shalt.err (!%p2772_p2)
}
  0x3e   : > { %2502 = dma.hbm_to_vmem [thread:$0]  (!%p3005_p11), %s3877_s3, 1024, %s3009_s10, [#allocation6], %s2912_s19, %s2912_s19, %s2913_s20  }
  0x3f   : > { %s3070_s8 = sadd.s32 1, %s2908_s24   ;;  %s34_s26 = sadd.s32 1, %s2904_s23 }
  0x40   : > { %s31_s30 = ssub.s32 %s2908_s24, %s3070_s8  ;;  %p41_p13 = scmp.ne.s32.totalorder %s2904_s23, %s2900_s22 }
  0x41   : > { %p32_p6 = scmp.eq.s32.totalorder %s31_s30, 0  ;;  %p42_p10 = scmp.eq.s32.totalorder %s2908_s24, 0 }
  0x42   : > { %p3888_p3 = scmp.eq.s32.totalorder %s2975_s25, 1  ;;  %p2516_p7 = scmp.lt.s32.totalorder %s2908_s24, 2 }
  0x43   : > { %s3086_s11 = scalar_select %p32_p6, %s2904_s23, %s34_s26  }
  0x44   : > { %p3080_p5 = por %p3888_p3, %p41_p13  ;;  %p43_p9 = por %p42_p10, %p41_p13 }
  0x45   : > { %s239_s12 = sand.u32 1, %s2904_s23   ;;  %s2081_s10 = sshll.u32 %s2908_s24, 11 }
  0x46   : > { %s3889_s9 = scalar_select %p3080_p5, 1, 0 }
  0x47   : > { %s1966_s13 = sshll.u32 %s239_s12, 7  ;;  %s3093_s16 = scalar_lea.hbm %s3874_s0, %s2081_s10 }
  0x48   : > { %s243_s7 = scalar_lea.vmem [#allocation2], %s1966_s13  ;;  %p3097_p11 = pnand %p2516_p7, %p43_p9 }
  0x49   : > { %s250_s17 = sshll.u32 %s243_s7, 4  ;;  %s3101_s26 = scalar_lea.sflag [#allocation3], %s239_s12  ;;  %s3095_s17 = int_to_ptr.vmem [resolvable:$true] %s250_s17 }
  0x4a   : > { %s2776_s30 = scalar_lea.hbm %s3093_s16, 2048  ;;  %p2778_p0 = pneg %p3097_p11 }
  0x4b   : > { %p2777_p12 = scmp.ne.s32.totalorder %s3093_s16, %s2776_s30  ;;  %s2781_s14 = scalar_lea.hbm %s3874_s0, 4096 }
  0x4c   : > { %p2782_p13 = scmp.lt.u32.totalorder %s3093_s16, %s3874_s0  ;;  %p2783_p6 = scmp.lt.u32.totalorder %s2781_s14, %s2776_s30 }
  0x4d   : > { %p2779_p1 = pnand %p2778_p0, %p2777_p12  ;;  %p2785_p3 = scmp.lt.u32.totalorder %s2776_s30, %s3093_s16 }
  0x4e   : > { %p2784_p10 = por %p2783_p6, %p2782_p13 }
  0x4f   : > { %p2780_p2 = pneg %p2779_p1 }
  0x50   : > { %p2786_p7 = por %p2785_p3, %p2784_p10 }
  0x52   : > { %p2787_p9 = pnand %p2786_p7, %p2780_p2 }
  0x54   : > { %2790 = shalt.err (!%p2787_p9)
}
  0x55   : > { %s2791_s12 = scalar_lea.vmem %s3095_s17, 2048  ;;  %s2914_s13 = smov [#allocation2]  }
  0x56   : > { %p2792_p12 = scmp.ne.s32.totalorder %s3095_s17, %s2791_s12  ;;  %s2796_s10 = sshll.u32 %s2914_s13, 4  ;;  %s2797_s10 = int_to_ptr.vmem [resolvable:$false] %s2796_s10 }
  0x57   : > { %s2798_s15 = scalar_lea.vmem %s2797_s10, 4096  ;;  %p2799_p4 = scmp.lt.s32.totalorder %s3095_s17, %s2797_s10 }
  0x58   : > { %p2794_p1 = pnand %p2792_p12, %p2778_p0  ;;  %p2800_p13 = scmp.lt.s32.totalorder %s2798_s15, %s2791_s12 }
  0x5a   : > { %p2795_p5 = pneg %p2794_p1  ;;  %p2801_p6 = por %p2800_p13, %p2799_p4 }
  0x5c   : > { %p2802_p10 = pnand %p2801_p6, %p2795_p5 }
  0x5e   : > { %2805 = shalt.err (!%p2802_p10)
}
  0x5f   : > { %2506 = dma.hbm_to_vmem [thread:$0]  (!%p3097_p11), %s3093_s16, 2048, %s3095_s17, %s3101_s26, %s2912_s19, %s2912_s19, %s2913_s20  }
  0x60   : > { %262 = sbr.rel (%p2994_p8) target bundleno = 564 (0x234), region = 40 }
  0x67   : > { %s3135_s30 = sand.u32 1, %s2900_s22   ;;  %p3891_p4 = scmp.ne.s32.totalorder %s3884_s27, 0 }
  0x68   : > { %s3138_s14 = sshll.u32 %s3135_s30, 7  ;;  %s265_s18 = scalar_lea.sflag [#allocation3], %s3135_s30 }
  0x69   : > { %s3142_s7 = scalar_lea.vmem [#allocation2], %s3138_s14 }
  0x6a   : > { %2879 = dma.done.wait (%p3891_p4), %s265_s18, 2048  }
  0x6b   : > { %2881 = vsyncadd (%p3891_p4), %s265_s18, 4294965248  ;;  %p3892_p5 = scmp.eq.s32.totalorder %s2975_s25, 0 }
  0x6d   : > { %2883 = dma.done.wait (%p3892_p5), [#allocation6], 2048   ;;  %p3893_p8 = pmov %p3892_p5 }
  0x6e   : > { %v2558_v0 = vld [vmem:[#allocation5] sm:$0xff]   ;;  %v2559_v1 = vld [vmem:[#allocation5 + $0x8] sm:$0xff]   ;;  %v2560_v2 = vld [vmem:[#allocation5 + $0x10] sm:$0xff]   ;;  %s3223_s16 = scalar_lea.vmem [#allocation9], %s3138_s14  ;;  %s3355_s17 = scalar_lea.vmem [#allocation8], %s3138_s14 }
  0x6f   : > { %2885 = vsyncadd (%p3893_p8), [#allocation6], 4294965248  ;;  %2386 = vmatprep.subr.bf16.mxu0 %v2558_v0  ;;  %v2561_v3 = vld [vmem:[#allocation5 + $0x18] sm:$0xff]   ;;  %v2566_v4 = vld [vmem:[%s3142_s7] sm:$0xff]   ;;  %s2146_s15 = sshll.u32 %s2975_s25, 11  ;;  %s1837_s14 = sshll.u32 %s3223_s16, 4  ;;  %s3772_s14 = int_to_ptr.vmem [resolvable:$true] %s1837_s14 }
  0x70   : > { %2387 = vmatpush3.bf16.msra.mxu0 %v2558_v0  ;;  %2402 = vmatprep.mubr.bf16.mxu0 %v2566_v4  ;;  %v2568_v5 = vld [vmem:[#allocation7] sm:$0xff]   ;;  %v2571_v7 = vld [vmem:[#allocation7 + $0x8] sm:$0xff]   ;;  %v2572_v8 = vld [vmem:[#allocation7 + $0x10] sm:$0xff]   ;;  %s3770_s27 = scalar_lea.hbm %s3880_s6, %s2146_s15  ;;  %s1808_s29 = scalar_lea.sflag [#allocation10], %s3135_s30 }
  0x71   : > { %2388 = vmatprep.subr.bf16.mxu0 %v2559_v1  ;;  %2450 = vmatprep.mubr.bf16.mxu1 %v2566_v4  ;;  %v2562_v6 = vld [vmem:[#allocation5 + $0x20] sm:$0xff]   ;;  %v2563_v9 = vld [vmem:[#allocation5 + $0x28] sm:$0xff]   ;;  %v2575_v10 = vld [vmem:[#allocation7 + $0x18] sm:$0xff]   ;;  %s2806_s19 = scalar_lea.vmem %s3772_s14, 2048  ;;  %p3929_p0 = scmp.ne.s32.totalorder %s3889_s9, 0 }
  0x72   : > { %2434 = vmatprep.subr.bf16.mxu1 %v2568_v5  ;;  %v2564_v11 = vld [vmem:[#allocation5 + $0x30] sm:$0xff]   ;;  %v2576_v12 = vld [vmem:[#allocation7 + $0x20] sm:$0xff]   ;;  %v2565_v13 = vld [vmem:[#allocation5 + $0x38] sm:$0xff]   ;;  %p2807_p11 = scmp.ne.s32.totalorder %s3772_s14, %s2806_s19  ;;  %s2915_s20 = smov [#allocation9]  }
  0x73   : > { %2435 = vmatpush3.bf16.msra.mxu1 %v2568_v5  ;;  %v2579_v14 = vld [vmem:[#allocation7 + $0x28] sm:$0xff]   ;;  %v2580_v16 = vld [vmem:[#allocation7 + $0x30] sm:$0xff]   ;;  %v2583_v18 = vld [vmem:[#allocation7 + $0x38] sm:$0xff]   ;;  %s2810_s26 = sshll.u32 %s2915_s20, 4  ;;  %s2811_s26 = int_to_ptr.vmem [resolvable:$false] %s2810_s26 }
  0x74   : > { %2389 = vmatpush3.bf16.msra.mxu0 %v2559_v1  ;;  %2436 = vmatprep.subr.bf16.mxu1 %v2571_v7  ;;  %v2567_v15 = vld [vmem:[%s3142_s7 + $0x8] sm:$0xff]   ;;  %v2569_v17 = vld [vmem:[%s3142_s7 + $0x10] sm:$0xff]   ;;  %v2570_v19 = vld [vmem:[%s3142_s7 + $0x18] sm:$0xff]   ;;  %p2808_p2 = pnand %p2807_p11, %p3929_p0  ;;  %s2812_s12 = scalar_lea.vmem %s2811_s26, 4096 }
  0x75   : > { %2390 = vmatprep.subr.bf16.mxu0 %v2560_v2  ;;  %v2573_v20 = vld [vmem:[%s3142_s7 + $0x20] sm:$0xff]   ;;  %v2574_v21 = vld [vmem:[%s3142_s7 + $0x28] sm:$0xff]   ;;  %v2577_v22 = vld [vmem:[%s3142_s7 + $0x30] sm:$0xff]   ;;  %p2813_p7 = scmp.lt.s32.totalorder %s3772_s14, %s2811_s26  ;;  %p2814_p9 = scmp.lt.s32.totalorder %s2812_s12, %s2806_s19 }
  0x76   : > { %v2578_v23 = vld [vmem:[%s3142_s7 + $0x38] sm:$0xff]   ;;  %v2581_v24 = vld [vmem:[%s3142_s7 + $0x40] sm:$0xff]   ;;  %v2582_v25 = vld [vmem:[%s3142_s7 + $0x48] sm:$0xff]   ;;  %p2809_p3 = pneg %p2808_p2 }
  0x77   : > { %2437 = vmatpush3.bf16.msra.mxu1 %v2571_v7  ;;  %v2584_v26 = vld [vmem:[%s3142_s7 + $0x50] sm:$0xff]   ;;  %v2585_v27 = vld [vmem:[%s3142_s7 + $0x58] sm:$0xff]   ;;  %v2586_v28 = vld [vmem:[%s3142_s7 + $0x60] sm:$0xff]   ;;  %p2815_p12 = por %p2814_p9, %p2813_p7 }
  0x78   : > { %2391 = vmatpush3.bf16.msra.mxu0 %v2560_v2  ;;  %2438 = vmatprep.subr.bf16.mxu1 %v2572_v8  ;;  %v2587_v29 = vld [vmem:[%s3142_s7 + $0x68] sm:$0xff]   ;;  %v2588_v30 = vld [vmem:[%s3142_s7 + $0x70] sm:$0xff]   ;;  %v2589_v31 = vld [vmem:[%s3142_s7 + $0x78] sm:$0xff]  }
  0x79   : > { %2392 = vmatprep.subr.bf16.mxu0 %v2561_v3  ;;  %v3171_v32 = vld [vmem:[%s3876_s2] ss:$0 sm:$0xff]  ;;  %p2816_p1 = pnand %p2815_p12, %p2809_p3 }
  0x7a   : > { %v3198_v59 = vld [vmem:[%s3878_s4] ss:$0 sm:$0xff] }
  0x7b   : > { %2439 = vmatpush3.bf16.msra.mxu1 %v2572_v8 }
  0x7c   : > { %2393 = vmatpush3.bf16.msra.mxu0 %v2561_v3  ;;  %2440 = vmatprep.subr.bf16.mxu1 %v2575_v10 }
  0x7d   : > { %2394 = vmatprep.subr.bf16.mxu0 %v2562_v6 }
  0x7f   : > { %2441 = vmatpush3.bf16.msra.mxu1 %v2575_v10 }
  0x80   : > { %2395 = vmatpush3.bf16.msra.mxu0 %v2562_v6  ;;  %2442 = vmatprep.subr.bf16.mxu1 %v2576_v12 }
  0x81   : > { %2396 = vmatprep.subr.bf16.mxu0 %v2563_v9 }
  0x83   : > { %2443 = vmatpush3.bf16.msra.mxu1 %v2576_v12 }
  0x84   : > { %2397 = vmatpush3.bf16.msra.mxu0 %v2563_v9  ;;  %2444 = vmatprep.subr.bf16.mxu1 %v2579_v14 }
  0x85   : > { %2398 = vmatprep.subr.bf16.mxu0 %v2564_v11 }
  0x87   : > { %2445 = vmatpush3.bf16.msra.mxu1 %v2579_v14 }
  0x88   : > { %2399 = vmatpush3.bf16.msra.mxu0 %v2564_v11  ;;  %2446 = vmatprep.subr.bf16.mxu1 %v2580_v16 }
  0x89   : > { %2400 = vmatprep.subr.bf16.mxu0 %v2565_v13 }
  0x8b   : > { %2447 = vmatpush3.bf16.msra.mxu1 %v2580_v16 }
  0x8c   : > { %2401 = vmatpush3.bf16.msra.mxu0 %v2565_v13  ;;  %2448 = vmatprep.subr.bf16.mxu1 %v2583_v18 }
  0x8f   : > { %2403 = vmatmul.mubr.bf16.vlgmr.msra.gmra.mrb[0].mxu0 %v2567_v15  ;;  %2449 = vmatpush3.bf16.msra.mxu1 %v2583_v18 }
  0x90   : > { %2406 = vmatprep.mubr.bf16.mxu0 %v2569_v17 }
  0x92   : > { %2451 = vmatmul.mubr.bf16.vlgmr.msra.gmra.mrb[0].mxu1 %v2567_v15 }
  0x93   : > { %2454 = vmatprep.mubr.bf16.mxu1 %v2569_v17 }
  0x97   : > { %2407 = vmatmul.mubr.bf16.gmra.mrb[4].mxu0 %v2570_v19 }
  0x98   : > { %2410 = vmatprep.mubr.bf16.mxu0 %v2573_v20 }
  0x9a   : > { %2455 = vmatmul.mubr.bf16.gmra.mrb[4].mxu1 %v2570_v19 }
  0x9b   : > { %2458 = vmatprep.mubr.bf16.mxu1 %v2573_v20 }
  0x9f   : > { %2411 = vmatmul.mubr.bf16.gmra.mrb[8].mxu0 %v2574_v21 }
  0xa0   : > { %2414 = vmatprep.mubr.bf16.mxu0 %v2577_v22 }
  0xa2   : > { %2459 = vmatmul.mubr.bf16.gmra.mrb[8].mxu1 %v2574_v21 }
  0xa3   : > { %2462 = vmatprep.mubr.bf16.mxu1 %v2577_v22 }
  0xa7   : > { %2415 = vmatmul.mubr.bf16.gmra.mrb[12].mxu0 %v2578_v23 }
  0xa8   : > { %2418 = vmatprep.mubr.bf16.mxu0 %v2581_v24 }
  0xaa   : > { %2463 = vmatmul.mubr.bf16.gmra.mrb[12].mxu1 %v2578_v23 }
  0xab   : > { %2466 = vmatprep.mubr.bf16.mxu1 %v2581_v24 }
  0xaf   : > { %2419 = vmatmul.mubr.bf16.gmra.mrb[16].mxu0 %v2582_v25 }
  0xb0   : > { %2422 = vmatprep.mubr.bf16.mxu0 %v2584_v26 }
  0xb2   : > { %2467 = vmatmul.mubr.bf16.gmra.mrb[16].mxu1 %v2582_v25 }
  0xb3   : > { %2470 = vmatprep.mubr.bf16.mxu1 %v2584_v26 }
  0xb7   : > { %2423 = vmatmul.mubr.bf16.gmra.mrb[20].mxu0 %v2585_v27 }
  0xb8   : > { %2426 = vmatprep.mubr.bf16.mxu0 %v2586_v28 }
  0xba   : > { %2471 = vmatmul.mubr.bf16.gmra.mrb[20].mxu1 %v2585_v27 }
  0xbb   : > { %2474 = vmatprep.mubr.bf16.mxu1 %v2586_v28 }
  0xbf   : > { %2427 = vmatmul.mubr.bf16.gmra.mrb[24].mxu0 %v2587_v29 }
  0xc0   : > { %2430 = vmatprep.mubr.bf16.mxu0 %v2588_v30 }
  0xc2   : > { %2475 = vmatmul.mubr.bf16.gmra.mrb[24].mxu1 %v2587_v29 }
  0xc3   : > { %2478 = vmatprep.mubr.bf16.mxu1 %v2588_v30 }
  0xc7   : > { %2431 = vmatmul.mubr.bf16.gmra.mrb[28].mxu0 %v2589_v31 }
  0xca   : > { %2479 = vmatmul.mubr.bf16.gmra.mrb[28].mxu1 %v2589_v31 }
 0x162   : > { %v2404_v33 = vpop.f32.mrb[0].mxu0 }
 0x163   : > { %v3174_v34 = vadd.f32 %v2404_v33, %v3171_v32  ;;  %v547_v35 = vpop.f32.mrb[1].mxu0 }
 0x164   : > { %v3177_v36 = vadd.f32 %v3171_v32, %v547_v35  ;;  %v2405_v37 = vpop.f32.mrb[2].mxu0 }
 0x165   : > { %v676_v38 = vand.u32 2147483647, %v3174_v34  ;;  %v3181_v39 = vadd.f32 %v2405_v37, %v3171_v32  ;;  %v550_v40 = vpop.f32.mrb[3].mxu0  ;;  %v2452_v58 = vpop.f32.mrb[0].mxu1  ;;  %vm804_vm0 = vcmp.ge.f32.partialorder %v3174_v34, 0.0 }
 0x166   : > { %v674_v41 = vand.u32 2147483647, %v3177_v36  ;;  %v3185_v42 = vadd.f32 %v3171_v32, %v550_v40  ;;  %v1515_v63 = vpop.f32.mrb[1].mxu1  ;;  %v1524_v5 = vadd.f32 %v2452_v58, %v3198_v59  ;;  %vm802_vm1 = vcmp.ge.f32.partialorder %v3177_v36, 0.0 }
 0x167   : > { %v708_v43 = vsub.f32 0.0, %v676_v38  ;;  %v677_v44 = vand.u32 2147483647, %v3181_v39  ;;  %v2453_v2 = vpop.f32.mrb[2].mxu1  ;;  %v1516_v9 = vadd.f32 %v3198_v59, %v1515_v63  ;;  %vm805_vm2 = vcmp.ge.f32.partialorder %v3181_v39, 0.0 }
 0x168   : > { %v706_v45 = vsub.f32 0.0, %v674_v41  ;;  %v675_v46 = vand.u32 2147483647, %v3185_v42  ;;  %v1518_v6 = vpop.f32.mrb[3].mxu1  ;;  %v1527_v12 = vadd.f32 %v2453_v2, %v3198_v59  ;;  %vm803_vm3 = vcmp.ge.f32.partialorder %v3185_v42, 0.0 }
 0x169   : > { %v742_v47 = vmul.f32 1.442695, %v708_v43  ;;  %v709_v48 = vsub.f32 0.0, %v677_v44  ;;  %v1519_v13 = vadd.f32 %v3198_v59, %v1518_v6 }
 0x16a   : > { %v738_v49 = vmul.f32 1.442695, %v706_v45  ;;  %v707_v50 = vsub.f32 0.0, %v675_v46  ;;  %v2408_v51 = vpop.f32.mrb[4].mxu0  ;;  %v2236_v20 = vpack.c.bf16 %v1527_v12, %v1524_v5 }
 0x16b   : > { %2590 = vpow2.f32 %v742_v47  ;;  %v744_v52 = vmul.f32 1.442695, %v709_v48  ;;  %v3190_v53 = vadd.f32 %v2408_v51, %v3171_v32  ;;  %v563_v54 = vpop.f32.mrb[5].mxu0  ;;  %v2231_v22 = vpack.c.bf16 %v1519_v13, %v1516_v9 }
 0x16c   : > { %2592 = vpow2.f32 %v738_v49  ;;  %v740_v55 = vmul.f32 1.442695, %v707_v50  ;;  %v3193_v56 = vadd.f32 %v3171_v32, %v563_v54  ;;  %v2409_v57 = vpop.f32.mrb[6].mxu0  ;;  %2323 = vst [vmem:[%s3223_s16 + $0x8] sm:$0xff] %v2236_v20  }
 0x16d   : > { %2594 = vpow2.f32 %v744_v52  ;;  %v680_v60 = vand.u32 2147483647, %v3190_v53  ;;  %v3202_v61 = vadd.f32 %v2409_v57, %v3171_v32  ;;  %v566_v62 = vpop.f32.mrb[7].mxu0  ;;  %v3217_v23 = vpop.f32.mrb[4].mxu1  ;;  %2232 = vst [vmem:[%s3223_s16] sm:$0xff] %v2231_v22   ;;  %vm808_vm4 = vcmp.ge.f32.partialorder %v3190_v53, 0.0 }
 0x16e   : > { %v678_v0 = vand.u32 2147483647, %v3193_v56  ;;  %v3206_v1 = vadd.f32 %v3171_v32, %v566_v62  ;;  %2596 = vpow2.f32 %v740_v55  ;;  %v3226_v26 = vpop.f32.mrb[5].mxu1  ;;  %vm806_vm5 = vcmp.ge.f32.partialorder %v3193_v56, 0.0 }
 0x16f   : > { %v712_v3 = vsub.f32 0.0, %v680_v60  ;;  %v681_v4 = vand.u32 2147483647, %v3202_v61  ;;  %v3233_v31 = vpop.f32.mrb[6].mxu1  ;;  %vm809_vm6 = vcmp.ge.f32.partialorder %v3202_v61, 0.0 }
 0x170   : > { %v710_v7 = vsub.f32 0.0, %v678_v0  ;;  %v679_v8 = vand.u32 2147483647, %v3206_v1  ;;  %v3236_v40 = vpop.f32.mrb[7].mxu1  ;;  %vm807_vm7 = vcmp.ge.f32.partialorder %v3206_v1, 0.0 }
 0x171   : > { %v750_v10 = vmul.f32 1.442695, %v712_v3  ;;  %v713_v11 = vsub.f32 0.0, %v681_v4 }
 0x172   : > { %v746_v14 = vmul.f32 1.442695, %v710_v7  ;;  %v711_v15 = vsub.f32 0.0, %v679_v8  ;;  %v2412_v16 = vpop.f32.mrb[8].mxu0 }
 0x173   : > { %2598 = vpow2.f32 %v750_v10  ;;  %v752_v17 = vmul.f32 1.442695, %v713_v11  ;;  %v3215_v18 = vadd.f32 %v2412_v16, %v3171_v32  ;;  %v579_v19 = vpop.f32.mrb[9].mxu0 }
 0x174   : > { %2600 = vpow2.f32 %v746_v14  ;;  %v2413_v21 = vpop.f32.mrb[10].mxu0  ;;  %v748_v29 = vmul.f32 1.442695, %v711_v15  ;;  %v3230_v30 = vadd.f32 %v3171_v32, %v579_v19 }
 0x175   : > { %v2591_v24 = vpop.eup %2590  ;;  %v3220_v25 = vpop.f32.mrb[11].mxu0  ;;  %2602 = vpow2.f32 %v752_v17  ;;  %v684_v38 = vand.u32 2147483647, %v3215_v18  ;;  %v3243_v60 = vadd.f32 %v2413_v21, %v3171_v32  ;;  %vm812_vm8 = vcmp.ge.f32.partialorder %v3215_v18, 0.0 }
 0x176   : > { %v2593_v27 = vpop.eup %2592  ;;  %v836_v28 = vmul.f32 2.0, %v2591_v24  ;;  %v1028_v35 = vmul.f32 %v2591_v24, %v2591_v24  ;;  %2604 = vpow2.f32 %v748_v29  ;;  %v3255_v5 = vpop.f32.mrb[8].mxu1  ;;  %vm810_vm9 = vcmp.ge.f32.partialorder %v3230_v30, 0.0 }
 0x177   : > { %v2595_v33 = vpop.eup %2594  ;;  %v834_v37 = vmul.f32 2.0, %v2593_v27  ;;  %v1026_v49 = vmul.f32 %v2593_v27, %v2593_v27  ;;  %v3250_v2 = vsub.f32 0.0, %v684_v38  ;;  %v3261_v11 = vpop.f32.mrb[9].mxu1  ;;  %vm813_vm10 = vcmp.ge.f32.partialorder %v3243_v60, 0.0 }
 0x178   : > { %v868_v41 = vmul.f32 %v2591_v24, %v836_v28  ;;  %v932_v43 = vadd.f32 1.0, %v836_v28  ;;  %v996_v44 = vadd.f32 2.0, %v836_v28  ;;  %v837_v45 = vmul.f32 2.0, %v2595_v33  ;;  %v2597_v50 = vpop.eup %2596  ;;  %v3265_v16 = vpop.f32.mrb[10].mxu1 }
 0x179   : > { %v866_v46 = vmul.f32 %v2593_v27, %v834_v37  ;;  %v930_v47 = vadd.f32 1.0, %v834_v37  ;;  %v994_v48 = vadd.f32 2.0, %v834_v37  ;;  %v1029_v9 = vmul.f32 %v2595_v33, %v2595_v33  ;;  %v3267_v22 = vpop.f32.mrb[11].mxu1 }
 0x17a   : > { %v964_v51 = vadd.f32 %v932_v43, %v868_v41  ;;  %v1060_v52 = vadd.f32 %v1028_v35, %v996_v44  ;;  %v869_v54 = vmul.f32 %v2595_v33, %v837_v45  ;;  %v3239_v55 = vpop.f32.mrb[12].mxu0  ;;  %v933_v0 = vadd.f32 1.0, %v837_v45 }
 0x17b   : > { %v962_v57 = vadd.f32 %v930_v47, %v866_v46  ;;  %v1058_v58 = vadd.f32 %v1026_v49, %v994_v48  ;;  %v3245_v62 = vpop.f32.mrb[13].mxu0  ;;  %v997_v8 = vadd.f32 2.0, %v837_v45  ;;  %v900_v13 = vsel %vm804_vm0, %v868_v41, 2.0 }
 0x17c   : > { %v1092_v63 = vsel %vm804_vm0, %v964_v51, %v1060_v52  ;;  %v3253_v4 = vpop.f32.mrb[14].mxu0  ;;  %v965_v14 = vadd.f32 %v933_v0, %v869_v54  ;;  %v835_v15 = vmul.f32 2.0, %v2597_v50  ;;  %v1027_v19 = vmul.f32 %v2597_v50, %v2597_v50 }
 0x17d   : > { %v2599_v6 = vpop.eup %2598  ;;  %2606 = vrcp.f32 %v1092_v63  ;;  %v1090_v7 = vsel %vm802_vm1, %v962_v57, %v1058_v58  ;;  %v3259_v10 = vpop.f32.mrb[15].mxu0  ;;  %v1061_v17 = vadd.f32 %v1029_v9, %v997_v8  ;;  %v1124_v43 = vmul.f32 %v900_v13, %v3174_v34 }
 0x17e   : > { %v2601_v12 = vpop.eup %2600  ;;  %2608 = vrcp.f32 %v1090_v7  ;;  %v840_v20 = vmul.f32 2.0, %v2599_v6  ;;  %v1032_v21 = vmul.f32 %v2599_v6, %v2599_v6  ;;  %v867_v24 = vmul.f32 %v2597_v50, %v835_v15  ;;  %v3286_v7 = vpop.f32.mrb[12].mxu1 }
 0x17f   : > { %v931_v27 = vadd.f32 1.0, %v835_v15  ;;  %v995_v28 = vadd.f32 2.0, %v835_v15  ;;  %v838_v29 = vmul.f32 2.0, %v2601_v12  ;;  %v2603_v33 = vpop.eup %2602  ;;  %v1093_v35 = vsel %vm805_vm2, %v965_v14, %v1061_v17  ;;  %v3292_v14 = vpop.f32.mrb[13].mxu1 }
 0x180   : > { %v872_v37 = vmul.f32 %v2599_v6, %v840_v20  ;;  %v936_v38 = vadd.f32 1.0, %v840_v20  ;;  %v1000_v41 = vadd.f32 2.0, %v840_v20  ;;  %2610 = vrcp.f32 %v1093_v35 }
 0x181   : > { %v963_v44 = vadd.f32 %v931_v27, %v867_v24  ;;  %v1059_v45 = vadd.f32 %v1027_v19, %v995_v28  ;;  %v898_v48 = vsel %vm802_vm1, %v866_v46, 2.0  ;;  %v901_v49 = vsel %vm805_vm2, %v869_v54, 2.0  ;;  %v2605_v46 = vpop.eup %2604  ;;  %v3298_v19 = vpop.f32.mrb[14].mxu1 }
 0x182   : > { %v3273_v47 = vpop.f32.mrb[16].mxu0  ;;  %v968_v50 = vadd.f32 %v936_v38, %v872_v37  ;;  %v1064_v51 = vadd.f32 %v1032_v21, %v1000_v41  ;;  %v870_v58 = vmul.f32 %v2601_v12, %v838_v29  ;;  %v934_v63 = vadd.f32 1.0, %v838_v29  ;;  %3894 = vst [vmem:[#allocation15_spill] sm:$0xff] %v3298_v19  ;;  %v3302_v35 = vpop.f32.mrb[15].mxu1 }
 0x183   : > { %v3280_v52 = vpop.f32.mrb[17].mxu0  ;;  %v1091_v57 = vsel %vm803_vm3, %v963_v44, %v1059_v45  ;;  %v1030_v0 = vmul.f32 %v2601_v12, %v2601_v12  ;;  %v998_v8 = vadd.f32 2.0, %v838_v29  ;;  %v841_v9 = vmul.f32 2.0, %v2603_v33  ;;  %3895 = vst [vmem:[#allocation16_spill] sm:$0xff] %v3302_v35 }
 0x184   : > { %v3284_v6 = vpop.f32.mrb[18].mxu0  ;;  %2612 = vrcp.f32 %v1091_v57  ;;  %v1096_v54 = vsel %vm808_vm4, %v968_v50, %v1064_v51  ;;  %v899_v15 = vsel %vm803_vm3, %v867_v24, 2.0  ;;  %v904_v12 = vsel %vm808_vm4, %v872_v37, 2.0 }
 0x185   : > { %v3290_v13 = vpop.f32.mrb[19].mxu0  ;;  %2614 = vrcp.f32 %v1096_v54  ;;  %v966_v17 = vadd.f32 %v934_v63, %v870_v58  ;;  %v1122_v21 = vmul.f32 %v898_v48, %v3177_v36  ;;  %v1062_v27 = vadd.f32 %v1030_v0, %v998_v8 }
 0x186   : > { %v873_v28 = vmul.f32 %v2603_v33, %v841_v9  ;;  %v937_v29 = vadd.f32 1.0, %v841_v9  ;;  %v1125_v24 = vmul.f32 %v901_v49, %v3181_v39  ;;  %v1001_v41 = vadd.f32 2.0, %v841_v9 }
 0x187   : > { %v2607_v20 = vpop.eup %2606  ;;  %v1033_v44 = vmul.f32 %v2603_v33, %v2603_v33  ;;  %v839_v37 = vmul.f32 2.0, %v2605_v46  ;;  %v1123_v45 = vmul.f32 %v899_v15, %v3185_v42  ;;  %v1128_v50 = vmul.f32 %v904_v12, %v3190_v53 }
 0x188   : > { %v2609_v38 = vpop.eup %2608  ;;  %v1094_v48 = vsel %vm806_vm5, %v966_v17, %v1062_v27  ;;  %v969_v51 = vadd.f32 %v937_v29, %v873_v28  ;;  %v1188_v57 = vmul.f32 %v2607_v20, %v1124_v43  ;;  %v902_v63 = vsel %vm806_vm5, %v870_v58, 2.0 }
 0x189   : > { %2616 = vrcp.f32 %v1094_v48  ;;  %v1065_v0 = vadd.f32 %v1033_v44, %v1001_v41  ;;  %v871_v49 = vmul.f32 %v2605_v46, %v839_v37  ;;  %v935_v8 = vadd.f32 1.0, %v839_v37 }
 0x18a   : > { %v3311_v54 = vpop.f32.mrb[20].mxu0  ;;  %v999_v33 = vadd.f32 2.0, %v839_v37  ;;  %v1031_v9 = vmul.f32 %v2605_v46, %v2605_v46  ;;  %v2611_v15 = vpop.eup %2610  ;;  %v758_v17 = vmul.f32 1.442695, %v3250_v2  ;;  %v3896_v43 = vand.u32 2147483647, %v3230_v30 }
 0x18b   : > { %v3313_v3 = vpop.f32.mrb[21].mxu0  ;;  %v1097_v12 = vsel %vm809_vm6, %v969_v51, %v1065_v0  ;;  %v685_v58 = vand.u32 2147483647, %v3243_v60  ;;  %v1189_v29 = vmul.f32 %v2611_v15, %v1125_v24  ;;  %v1126_v41 = vmul.f32 %v902_v63, %v3193_v56  ;;  %v3326_v37 = vpop.f32.mrb[16].mxu1 }
 0x18c   : > { %v714_v20 = vsub.f32 0.0, %v3896_v43  ;;  %v3321_v27 = vpop.f32.mrb[22].mxu0  ;;  %2618 = vrcp.f32 %v1097_v12  ;;  %v967_v46 = vadd.f32 %v935_v8, %v871_v49  ;;  %v1186_v48 = vmul.f32 %v2609_v38, %v1122_v21  ;;  %v3328_v0 = vpop.f32.mrb[17].mxu1 }
 0x18d   : > { %v3324_v44 = vpop.f32.mrb[23].mxu0  ;;  %v1063_v51 = vadd.f32 %v1031_v9, %v999_v33  ;;  %2620 = vpow2.f32 %v758_v17  ;;  %3897 = vst [vmem:[#allocation17_spill] sm:$0xff] %v3328_v0  ;;  %v1220_v35 = vsub.f32 %v3174_v34, %v1188_v57  ;;  %v1221_v19 = vsub.f32 %v3181_v39, %v1189_v29  ;;  %v3336_v8 = vpop.f32.mrb[18].mxu1 }
 0x18e   : > { %v754_v2 = vmul.f32 1.442695, %v714_v20  ;;  %v2613_v43 = vpop.eup %2612  ;;  %v717_v24 = vsub.f32 0.0, %v685_v58  ;;  %v3334_v63 = vadd.f32 %v3171_v32, %v3220_v25  ;;  %3898 = vst [vmem:[#allocation18_spill] sm:$0xff] %v3336_v8  ;;  %v3342_v33 = vadd.f32 %v3239_v55, %v3171_v32  ;;  %v3344_v34 = vpop.f32.mrb[19].mxu1 }
 0x18f   : > { %v2615_v15 = vpop.eup %2614  ;;  %v1187_v21 = vmul.f32 %v2613_v43, %v1123_v45  ;;  %v1095_v38 = vsel %vm807_vm7, %v967_v46, %v1063_v51  ;;  %3899 = vst [vmem:[#allocation19_spill] sm:$0xff] %v3344_v34  ;;  %v2156_v39 = vpack.c.bf16 %v1221_v19, %v1220_v35  ;;  %v905_v25 = vsel %vm809_vm6, %v873_v28, 2.0 }
 0x190   : > { %2622 = vpow2.f32 %v754_v2  ;;  %v760_v57 = vmul.f32 1.442695, %v717_v24  ;;  %v1218_v9 = vsub.f32 %v3177_v36, %v1186_v48  ;;  %v683_v12 = vand.u32 2147483647, %v3334_v63  ;;  %v3372_v48 = vpop.f32.mrb[20].mxu1 }
 0x191   : > { %2624 = vrcp.f32 %v1095_v38  ;;  %v1219_v45 = vsub.f32 %v3185_v42, %v1187_v21  ;;  %v688_v17 = vand.u32 2147483647, %v3342_v33  ;;  %2308 = vst [vmem:[%s3355_s17 + $0x8] sm:$0xff] %v2156_v39   ;;  %v1192_v55 = vmul.f32 %v2615_v15, %v1128_v50  ;;  %3900 = vst [vmem:[#allocation20_spill] sm:$0xff] %v3372_v48  ;;  %v3382_v43 = vpop.f32.mrb[21].mxu1 }
 0x192   : > { %v3352_v20 = vpop.f32.mrb[24].mxu0  ;;  %v903_v19 = vsel %vm807_vm7, %v871_v49, 2.0  ;;  %2626 = vpow2.f32 %v760_v57  ;;  %v3362_v36 = vadd.f32 %v3171_v32, %v3245_v62  ;;  %v715_v58 = vsub.f32 0.0, %v683_v12  ;;  %3901 = vst [vmem:[#allocation21_spill] sm:$0xff] %v3382_v43  ;;  %v3388_v57 = vpop.f32.mrb[22].mxu1 }
 0x193   : > { %v3364_v42 = vpop.f32.mrb[25].mxu0  ;;  %v2617_v28 = vpop.eup %2616  ;;  %v2151_v35 = vpack.c.bf16 %v1219_v45, %v1218_v9  ;;  %v720_v29 = vsub.f32 0.0, %v688_v17  ;;  %v3368_v46 = vadd.f32 %v3253_v4, %v3171_v32  ;;  %v1129_v49 = vmul.f32 %v905_v25, %v3202_v61  ;;  %3902 = vst [vmem:[#allocation22_spill] sm:$0xff] %v3388_v57 }
 0x194   : > { %v3370_v50 = vpop.f32.mrb[26].mxu0  ;;  %v686_v51 = vand.u32 2147483647, %v3362_v36  ;;  %v3378_v62 = vadd.f32 %v3171_v32, %v3259_v10  ;;  %v1190_v24 = vmul.f32 %v2617_v28, %v1126_v41  ;;  %v756_v4 = vmul.f32 1.442695, %v715_v58  ;;  %v3391_v17 = vpop.f32.mrb[23].mxu1 }
 0x195   : > { %v3380_v2 = vpop.f32.mrb[27].mxu0  ;;  %2152 = vst [vmem:[%s3355_s17] sm:$0xff] %v2151_v35   ;;  %v766_v15 = vmul.f32 1.442695, %v720_v29  ;;  %v689_v21 = vand.u32 2147483647, %v3368_v46  ;;  %v1127_v39 = vmul.f32 %v903_v19, %v3206_v1  ;;  %v1224_v9 = vsub.f32 %v3190_v53, %v1192_v55  ;;  %3903 = vst [vmem:[#allocation23_spill] sm:$0xff] %v3391_v17 }
 0x196   : > { %v2619_v38 = vpop.eup %2618  ;;  %v718_v25 = vsub.f32 0.0, %v686_v51  ;;  %2628 = vpow2.f32 %v756_v4  ;;  %v687_v35 = vand.u32 2147483647, %v3378_v62  ;;  %v1222_v19 = vsub.f32 %v3193_v56, %v1190_v24 }
 0x197   : > { %v2621_v10 = vpop.eup %2620  ;;  %v1193_v45 = vmul.f32 %v2619_v38, %v1129_v49  ;;  %v721_v12 = vsub.f32 0.0, %v689_v21  ;;  %2630 = vpow2.f32 %v766_v15  ;;  %v3398_v57 = vadd.f32 %v3273_v47, %v3171_v32 }
 0x198   : > { %v844_v41 = vmul.f32 2.0, %v2621_v10  ;;  %v762_v28 = vmul.f32 1.442695, %v718_v25  ;;  %v1036_v51 = vmul.f32 %v2621_v10, %v2621_v10  ;;  %v719_v48 = vsub.f32 0.0, %v687_v35 }
 0x199   : > { %v1225_v29 = vsub.f32 %v3202_v61, %v1193_v45  ;;  %v768_v61 = vmul.f32 1.442695, %v721_v12  ;;  %v3408_v45 = vpop.f32.mrb[24].mxu1  ;;  %v692_v35 = vand.u32 2147483647, %v3398_v57  ;;  %vm811_vm11 = vcmp.ge.f32.partialorder %v3334_v63, 0.0 }
 0x19a   : > { %v2623_v58 = vpop.eup %2622  ;;  %v3400_v53 = vpop.f32.mrb[28].mxu0  ;;  %v3402_v49 = vmul.f32 %v2621_v10, %v844_v41  ;;  %v940_v4 = vadd.f32 1.0, %v844_v41  ;;  %v1004_v15 = vadd.f32 2.0, %v844_v41  ;;  %2632 = vpow2.f32 %v762_v28  ;;  %3904 = vst [vmem:[#allocation24_spill] sm:$0xff] %v3408_v45 }
 0x19b   : > { %v2625_v55 = vpop.eup %2624  ;;  %v842_v21 = vmul.f32 2.0, %v2623_v58  ;;  %v3404_v38 = vpop.f32.mrb[29].mxu0  ;;  %v2166_v25 = vpack.c.bf16 %v1225_v29, %v1224_v9  ;;  %v1034_v12 = vmul.f32 %v2623_v58, %v2623_v58  ;;  %vm816_vm12 = vcmp.ge.f32.partialorder %v3342_v33, 0.0 }
 0x19c   : > { %v1191_v56 = vmul.f32 %v2625_v55, %v1127_v39  ;;  %v3406_v24 = vpop.f32.mrb[30].mxu0  ;;  %v2627_v47 = vpop.eup %2626  ;;  %v972_v17 = vadd.f32 %v940_v4, %v3402_v49  ;;  %v1068_v43 = vadd.f32 %v1036_v51, %v1004_v15  ;;  %vm814_vm13 = vcmp.ge.f32.partialorder %v3362_v36, 0.0 }
 0x19d   : > { %v874_v10 = vmul.f32 %v2623_v58, %v842_v21  ;;  %v3411_v34 = vpop.f32.mrb[31].mxu0  ;;  %v3413_v41 = vpop.f32.mrb[25].mxu1  ;;  %2310 = vst [vmem:[%s3355_s17 + $0x18] sm:$0xff] %v2166_v25   ;;  %v938_v39 = vadd.f32 1.0, %v842_v21  ;;  %v1002_v28 = vadd.f32 2.0, %v842_v21  ;;  %v845_v51 = vmul.f32 2.0, %v2627_v47 }
 0x19e   : > { %3905 = vst [vmem:[#allocation25_spill] sm:$0xff] %v3413_v41  ;;  %v1223_v9 = vsub.f32 %v3206_v1, %v1191_v56  ;;  %v3417_v29 = vpop.f32.mrb[26].mxu1  ;;  %v1100_v55 = vsel %vm812_vm8, %v972_v17, %v1068_v43  ;;  %v1037_v1 = vmul.f32 %v2627_v47, %v2627_v47  ;;  %v764_v17 = vmul.f32 1.442695, %v719_v48 }
 0x19f   : > { %3906 = vst [vmem:[#allocation26_spill] sm:$0xff] %v3417_v29  ;;  %v3423_v4 = vpop.f32.mrb[27].mxu1  ;;  %v970_v25 = vadd.f32 %v938_v39, %v874_v10  ;;  %v1066_v41 = vadd.f32 %v1034_v12, %v1002_v28  ;;  %2634 = vrcp.f32 %v1100_v55  ;;  %v877_v21 = vmul.f32 %v2627_v47, %v845_v51 }
 0x1a0   : > { %3907 = vst [vmem:[#allocation27_spill] sm:$0xff] %v3423_v4  ;;  %v2161_v15 = vpack.c.bf16 %v1223_v9, %v1222_v19  ;;  %v941_v58 = vadd.f32 1.0, %v845_v51  ;;  %v1005_v56 = vadd.f32 2.0, %v845_v51  ;;  %v2629_v45 = vpop.eup %2628  ;;  %2636 = vpow2.f32 %v768_v61  ;;  %v3431_v39 = vpop.f32.mrb[28].mxu1 }
 0x1a1   : > { %v1098_v43 = vsel %vm810_vm9, %v970_v25, %v1066_v41  ;;  %v2631_v29 = vpop.eup %2630  ;;  %v843_v19 = vmul.f32 2.0, %v2629_v45  ;;  %v724_v9 = vsub.f32 0.0, %v692_v35  ;;  %3908 = vst [vmem:[#allocation28_spill] sm:$0xff] %v3431_v39  ;;  %v1035_v28 = vmul.f32 %v2629_v45, %v2629_v45  ;;  %v3435_v48 = vpop.f32.mrb[29].mxu1 }
 0x1a2   : > { %2309 = vst [vmem:[%s3355_s17 + $0x10] sm:$0xff] %v2161_v15   ;;  %v973_v8 = vadd.f32 %v941_v58, %v877_v21  ;;  %v1069_v4 = vadd.f32 %v1037_v1, %v1005_v56  ;;  %2638 = vrcp.f32 %v1098_v43  ;;  %v848_v47 = vmul.f32 2.0, %v2631_v29  ;;  %3909 = vst [vmem:[#allocation29_spill] sm:$0xff] %v3435_v48  ;;  %v3437_v25 = vpop.f32.mrb[30].mxu1 }
 0x1a3   : > { %v1040_v12 = vmul.f32 %v2631_v29, %v2631_v29  ;;  %2640 = vpow2.f32 %v764_v17  ;;  %v875_v55 = vmul.f32 %v2629_v45, %v843_v19  ;;  %v939_v51 = vadd.f32 1.0, %v843_v19  ;;  %3910 = vst [vmem:[#allocation30_spill] sm:$0xff] %v3437_v25  ;;  %v3439_v43 = vpop.f32.mrb[31].mxu1 }
 0x1a4   : > { %v1101_v41 = vsel %vm813_vm10, %v973_v8, %v1069_v4  ;;  %v2633_v61 = vpop.eup %2632  ;;  %v1003_v15 = vadd.f32 2.0, %v843_v19  ;;  %v880_v1 = vmul.f32 %v2631_v29, %v848_v47  ;;  %v944_v58 = vadd.f32 1.0, %v848_v47  ;;  %3911 = vst [vmem:[#allocation31_spill] sm:$0xff] %v3439_v43 }
 0x1a5   : > { %2642 = vrcp.f32 %v1101_v41  ;;  %v1008_v35 = vadd.f32 2.0, %v848_v47  ;;  %v846_v56 = vmul.f32 2.0, %v2633_v61  ;;  %v908_v8 = vsel %vm812_vm8, %v3402_v49, 2.0 }
 0x1a6   : > { %v971_v4 = vadd.f32 %v939_v51, %v875_v55  ;;  %v1067_v17 = vadd.f32 %v1035_v28, %v1003_v15  ;;  %v906_v45 = vsel %vm810_vm9, %v874_v10, 2.0  ;;  %v909_v19 = vsel %vm813_vm10, %v877_v21, 2.0 }
 0x1a7   : > { %v976_v29 = vadd.f32 %v944_v58, %v880_v1  ;;  %v1072_v41 = vadd.f32 %v1040_v12, %v1008_v35  ;;  %v878_v43 = vmul.f32 %v2633_v61, %v846_v56  ;;  %v942_v25 = vadd.f32 1.0, %v846_v56 }
 0x1a8   : > { %v1099_v47 = vsel %vm811_vm11, %v971_v4, %v1067_v17  ;;  %vm817_vm14 = vcmp.ge.f32.partialorder %v3368_v46, 0.0  ;;  %v774_v49 = vmul.f32 1.442695, %v724_v9  ;;  %v1006_v15 = vadd.f32 2.0, %v846_v56 }
 0x1a9   : > { %v2635_v51 = vpop.eup %2634  ;;  %2644 = vrcp.f32 %v1099_v47  ;;  %v1104_v28 = vsel %vm816_vm12, %v976_v29, %v1072_v41  ;;  %v1038_v10 = vmul.f32 %v2633_v61, %v2633_v61  ;;  %v1132_v21 = vmul.f32 %v908_v8, %v3215_v18 }
 0x1aa   : > { %v2637_v48 = vpop.eup %2636  ;;  %v1130_v12 = vmul.f32 %v906_v45, %v3230_v30  ;;  %v1133_v58 = vmul.f32 %v909_v19, %v3243_v60  ;;  %v974_v35 = vadd.f32 %v942_v25, %v878_v43  ;;  %v907_v4 = vsel %vm811_vm11, %v875_v55, 2.0 }
 0x1ab   : > { %2646 = vrcp.f32 %v1104_v28  ;;  %v1070_v9 = vadd.f32 %v1038_v10, %v1006_v15  ;;  %v849_v17 = vmul.f32 2.0, %v2637_v48  ;;  %vm815_vm15 = vcmp.ge.f32.partialorder %v3378_v62, 0.0 }
 0x1ac   : > { %v2639_v47 = vpop.eup %2638  ;;  %v1196_v29 = vmul.f32 %v2635_v51, %v1132_v21  ;;  %v1041_v56 = vmul.f32 %v2637_v48, %v2637_v48  ;;  %2648 = vpow2.f32 %v774_v49  ;;  %v3462_v61 = vadd.f32 %v3171_v32, %v3280_v52 }
 0x1ad   : > { %v2641_v8 = vpop.eup %2640  ;;  %v1102_v25 = vsel %vm814_vm13, %v974_v35, %v1070_v9  ;;  %v881_v45 = vmul.f32 %v2637_v48, %v849_v17  ;;  %v945_v19 = vadd.f32 1.0, %v849_v17  ;;  %v1009_v55 = vadd.f32 2.0, %v849_v17 }
 0x1ae   : > { %v1131_v28 = vmul.f32 %v907_v4, %v3334_v63  ;;  %v912_v15 = vsel %vm816_vm12, %v880_v1, 2.0  ;;  %2650 = vrcp.f32 %v1102_v25  ;;  %v847_v51 = vmul.f32 2.0, %v2641_v8 }
 0x1af   : > { %v2643_v41 = vpop.eup %2642  ;;  %v910_v52 = vsel %vm814_vm13, %v878_v43, 2.0  ;;  %v977_v10 = vadd.f32 %v945_v19, %v881_v45  ;;  %v1073_v21 = vadd.f32 %v1041_v56, %v1009_v55  ;;  %v1039_v48 = vmul.f32 %v2641_v8, %v2641_v8 }
 0x1b0   : > { %v1197_v49 = vmul.f32 %v2643_v41, %v1133_v58  ;;  %v879_v39 = vmul.f32 %v2641_v8, %v847_v51  ;;  %v943_v0 = vadd.f32 1.0, %v847_v51  ;;  %v1007_v35 = vadd.f32 2.0, %v847_v51 }
 0x1b1   : > { %v1228_v9 = vsub.f32 %v3215_v18, %v1196_v29  ;;  %v1105_v4 = vsel %vm817_vm14, %v977_v10, %v1073_v21  ;;  %v690_v1 = vand.u32 2147483647, %v3462_v61  ;;  %v1194_v58 = vmul.f32 %v2639_v47, %v1130_v12 }
 0x1b2   : > { %v1229_v17 = vsub.f32 %v3243_v60, %v1197_v49  ;;  %2652 = vrcp.f32 %v1105_v4  ;;  %v975_v25 = vadd.f32 %v943_v0, %v879_v39  ;;  %v1071_v43 = vadd.f32 %v1039_v48, %v1007_v35 }
 0x1b3   : > { %v2645_v19 = vpop.eup %2644  ;;  %v913_v55 = vsel %vm817_vm14, %v881_v45, 2.0  ;;  %v722_v8 = vsub.f32 0.0, %v690_v1  ;;  %v3480_v18 = vadd.f32 %v3284_v6, %v3171_v32  ;;  %v3486_v12 = vadd.f32 %v3171_v32, %v3290_v13 }
 0x1b4   : > { %v2176_v56 = vpack.c.bf16 %v1229_v17, %v1228_v9  ;;  %v1195_v60 = vmul.f32 %v2645_v19, %v1131_v28  ;;  %v1103_v29 = vsel %vm815_vm15, %v975_v25, %v1071_v43  ;;  %v3490_v0 = vadd.f32 %v3311_v54, %v3171_v32 }
 0x1b5   : > { %v2647_v47 = vpop.eup %2646  ;;  %2654 = vrcp.f32 %v1103_v29  ;;  %v770_v45 = vmul.f32 1.442695, %v722_v8  ;;  %v693_v41 = vand.u32 2147483647, %v3480_v18  ;;  %v1226_v28 = vsub.f32 %v3230_v30, %v1194_v58 }
 0x1b6   : > { %2312 = vst [vmem:[%s3355_s17 + $0x28] sm:$0xff] %v2176_v56   ;;  %v2649_v6 = vpop.eup %2648  ;;  %v1227_v51 = vsub.f32 %v3334_v63, %v1195_v60  ;;  %v1136_v49 = vmul.f32 %v912_v15, %v3342_v33  ;;  %v691_v13 = vand.u32 2147483647, %v3486_v12  ;;  %v1134_v10 = vmul.f32 %v910_v52, %v3362_v36 }
 0x1b7   : > { %v1137_v54 = vmul.f32 %v913_v55, %v3368_v46  ;;  %v852_v21 = vmul.f32 2.0, %v2649_v6  ;;  %2656 = vpow2.f32 %v770_v45  ;;  %v725_v9 = vsub.f32 0.0, %v693_v41 }
 0x1b8   : > { %v2651_v35 = vpop.eup %2650  ;;  %v2171_v48 = vpack.c.bf16 %v1227_v51, %v1226_v28  ;;  %v723_v17 = vsub.f32 0.0, %v691_v13  ;;  %v696_v4 = vand.u32 2147483647, %v3490_v0  ;;  %v1044_v58 = vmul.f32 %v2649_v6, %v2649_v6 }
 0x1b9   : > { %v3501_v30 = vmul.f32 %v2649_v6, %v852_v21  ;;  %v948_v63 = vadd.f32 1.0, %v852_v21  ;;  %v1012_v1 = vadd.f32 2.0, %v852_v21  ;;  %v1200_v15 = vmul.f32 %v2647_v47, %v1136_v49 }
 0x1ba   : > { %2311 = vst [vmem:[%s3355_s17 + $0x20] sm:$0xff] %v2171_v48   ;;  %v776_v25 = vmul.f32 1.442695, %v725_v9  ;;  %v772_v43 = vmul.f32 1.442695, %v723_v17  ;;  %v728_v52 = vsub.f32 0.0, %v696_v4  ;;  %v1198_v19 = vmul.f32 %v2651_v35, %v1134_v10 }
 0x1bb   : > { %v911_v56 = vsel %vm815_vm15, %v879_v39, 2.0  ;;  %v980_v55 = vadd.f32 %v948_v63, %v3501_v30  ;;  %v1076_v8 = vadd.f32 %v1044_v58, %v1012_v1  ;;  %vm820_vm0 = vcmp.ge.f32.partialorder %v3398_v57, 0.0 }
 0x1bc   : > { %v2653_v60 = vpop.eup %2652  ;;  %2658 = vpow2.f32 %v776_v25  ;;  %v782_v29 = vmul.f32 1.442695, %v728_v52  ;;  %v3510_v45 = vadd.f32 %v3171_v32, %v3313_v3  ;;  %v3516_v39 = vadd.f32 %v3321_v27, %v3171_v32 }
 0x1bd   : > { %v1201_v47 = vmul.f32 %v2653_v60, %v1137_v54  ;;  %v1108_v41 = vsel %vm820_vm0, %v980_v55, %v1076_v8  ;;  %2660 = vpow2.f32 %v772_v43  ;;  %v1232_v6 = vsub.f32 %v3342_v33, %v1200_v15 }
 0x1be   : > { %v1135_v28 = vmul.f32 %v911_v56, %v3378_v62  ;;  %v694_v51 = vand.u32 2147483647, %v3510_v45  ;;  %v3523_v49 = vadd.f32 %v3171_v32, %v3324_v44  ;;  %v1230_v13 = vsub.f32 %v3362_v36, %v1198_v19 }
 0x1bf   : > { %v2655_v3 = vpop.eup %2654  ;;  %v1233_v10 = vsub.f32 %v3368_v46, %v1201_v47  ;;  %2662 = vpow2.f32 %v782_v29  ;;  %v697_v27 = vand.u32 2147483647, %v3516_v39  ;;  %v1540_v44 = vadd.f32 %v3217_v23, %v3198_v59 }
 0x1c0   : > { %v1199_v54 = vmul.f32 %v2655_v3, %v1135_v28  ;;  %2664 = vrcp.f32 %v1108_v41  ;;  %v726_v33 = vsub.f32 0.0, %v694_v51  ;;  %v695_v21 = vand.u32 2147483647, %v3523_v49 }
 0x1c1   : > { %v2657_v35 = vpop.eup %2656  ;;  %v2186_v48 = vpack.c.bf16 %v1233_v10, %v1232_v6  ;;  %v729_v9 = vsub.f32 0.0, %v697_v27  ;;  %v1532_v36 = vadd.f32 %v3198_v59, %v3226_v26  ;;  %v1543_v15 = vadd.f32 %v3233_v31, %v3198_v59 }
 0x1c2   : > { %v1231_v46 = vsub.f32 %v3378_v62, %v1199_v54  ;;  %v850_v17 = vmul.f32 2.0, %v2657_v35  ;;  %v1042_v4 = vmul.f32 %v2657_v35, %v2657_v35  ;;  %v778_v63 = vmul.f32 1.442695, %v726_v33 }
 0x1c3   : > { %2314 = vst [vmem:[%s3355_s17 + $0x38] sm:$0xff] %v2186_v48   ;;  %v784_v1 = vmul.f32 1.442695, %v729_v9  ;;  %v727_v58 = vsub.f32 0.0, %v695_v21  ;;  %v1535_v25 = vadd.f32 %v3198_v59, %v3236_v40  ;;  %v2246_v19 = vpack.c.bf16 %v1543_v15, %v1540_v44 }
 0x1c4   : > { %v2181_v43 = vpack.c.bf16 %v1231_v46, %v1230_v13  ;;  %v882_v23 = vmul.f32 %v2657_v35, %v850_v17  ;;  %v946_v52 = vadd.f32 1.0, %v850_v17  ;;  %v1010_v26 = vadd.f32 2.0, %v850_v17 }
 0x1c5   : > { %2666 = vpow2.f32 %v778_v63  ;;  %v780_v62 = vmul.f32 1.442695, %v727_v58  ;;  %v2241_v56 = vpack.c.bf16 %v1535_v25, %v1532_v36  ;;  %v916_v59 = vsel %vm820_vm0, %v3501_v30, 2.0  ;;  %2325 = vst [vmem:[%s3223_s16 + $0x18] sm:$0xff] %v2246_v19  }
 0x1c6   : > { %v2659_v55 = vpop.eup %2658  ;;  %2313 = vst [vmem:[%s3355_s17 + $0x30] sm:$0xff] %v2181_v43   ;;  %v978_v8 = vadd.f32 %v946_v52, %v882_v23  ;;  %v1074_v60 = vadd.f32 %v1042_v4, %v1010_v26  ;;  %2668 = vpow2.f32 %v784_v1  ;;  %vm818_vm1 = vcmp.ge.f32.partialorder %v3462_v61, 0.0 }
 0x1c7   : > { %v2661_v29 = vpop.eup %2660  ;;  %vm821_vm2 = vcmp.ge.f32.partialorder %v3480_v18, 0.0  ;;  %v853_v31 = vmul.f32 2.0, %v2659_v55  ;;  %2324 = vst [vmem:[%s3223_s16 + $0x10] sm:$0xff] %v2241_v56   ;;  %v1045_v47 = vmul.f32 %v2659_v55, %v2659_v55  ;;  %2670 = vpow2.f32 %v780_v62 }
 0x1c8   : > { %v1106_v40 = vsel %vm818_vm1, %v978_v8, %v1074_v60  ;;  %v851_v41 = vmul.f32 2.0, %v2661_v29  ;;  %v3551_v30 = vadd.f32 %v3352_v20, %v3171_v32  ;;  %vm819_vm3 = vcmp.ge.f32.partialorder %v3486_v12, 0.0 }
 0x1c9   : > { %v2663_v6 = vpop.eup %2662  ;;  %2672 = vrcp.f32 %v1106_v40  ;;  %v885_v28 = vmul.f32 %v2659_v55, %v853_v31  ;;  %v949_v51 = vadd.f32 1.0, %v853_v31  ;;  %v1013_v13 = vadd.f32 2.0, %v853_v31 }
 0x1ca   : > { %v2665_v3 = vpop.eup %2664  ;;  %v883_v10 = vmul.f32 %v2661_v29, %v851_v41  ;;  %v947_v27 = vadd.f32 1.0, %v851_v41  ;;  %v1011_v54 = vadd.f32 2.0, %v851_v41  ;;  %v1043_v21 = vmul.f32 %v2661_v29, %v2661_v29 }
 0x1cb   : > { %v981_v33 = vadd.f32 %v949_v51, %v885_v28  ;;  %v856_v35 = vmul.f32 2.0, %v2663_v6  ;;  %v1140_v48 = vmul.f32 %v916_v59, %v3398_v57  ;;  %v1077_v9 = vadd.f32 %v1045_v47, %v1013_v13 }
 0x1cc   : > { %v979_v44 = vadd.f32 %v947_v27, %v883_v10  ;;  %vm824_vm4 = vcmp.ge.f32.partialorder %v3490_v0, 0.0  ;;  %v914_v32 = vsel %vm818_vm1, %v882_v23, 2.0  ;;  %v1075_v20 = vadd.f32 %v1043_v21, %v1011_v54 }
 0x1cd   : > { %v888_v36 = vmul.f32 %v2663_v6, %v856_v35  ;;  %v952_v46 = vadd.f32 1.0, %v856_v35  ;;  %vm822_vm5 = vcmp.ge.f32.partialorder %v3510_v45, 0.0  ;;  %v1109_v17 = vsel %vm821_vm2, %v981_v33, %v1077_v9 }
 0x1ce   : > { %v1016_v4 = vadd.f32 2.0, %v856_v35  ;;  %v1048_v63 = vmul.f32 %v2663_v6, %v2663_v6  ;;  %vm825_vm6 = vcmp.ge.f32.partialorder %v3516_v39, 0.0  ;;  %v700_v1 = vand.u32 2147483647, %v3551_v30 }
 0x1cf   : > { %v2667_v58 = vpop.eup %2666  ;;  %v3563_v15 = vmul.f32 %v2665_v3, %v1140_v48  ;;  %2674 = vrcp.f32 %v1109_v17  ;;  %v1107_v25 = vsel %vm819_vm3, %v979_v44, %v1075_v20  ;;  %v984_v43 = vadd.f32 %v952_v46, %v888_v36 }
 0x1d0   : > { %v2669_v23 = vpop.eup %2668  ;;  %v917_v52 = vsel %vm821_vm2, %v885_v28, 2.0  ;;  %2676 = vrcp.f32 %v1107_v25  ;;  %v1080_v26 = vadd.f32 %v1048_v63, %v1016_v4  ;;  %v854_v62 = vmul.f32 2.0, %v2667_v58 }
 0x1d1   : > { %v1046_v19 = vmul.f32 %v2667_v58, %v2667_v58  ;;  %v857_v56 = vmul.f32 2.0, %v2669_v23  ;;  %v1049_v55 = vmul.f32 %v2669_v23, %v2669_v23  ;;  %v732_v8 = vsub.f32 0.0, %v700_v1  ;;  %v2671_v60 = vpop.eup %2670 }
 0x1d2   : > { %v1112_v29 = vsel %vm824_vm4, %v984_v43, %v1080_v26  ;;  %v886_v59 = vmul.f32 %v2667_v58, %v854_v62  ;;  %v950_v31 = vadd.f32 1.0, %v854_v62  ;;  %v1014_v40 = vadd.f32 2.0, %v854_v62 }
 0x1d3   : > { %v2673_v47 = vpop.eup %2672  ;;  %2678 = vrcp.f32 %v1112_v29  ;;  %v889_v41 = vmul.f32 %v2669_v23, %v857_v56  ;;  %v953_v6 = vadd.f32 1.0, %v857_v56  ;;  %v1017_v51 = vadd.f32 2.0, %v857_v56 }
 0x1d4   : > { %vm823_vm7 = vcmp.ge.f32.partialorder %v3523_v49, 0.0  ;;  %v1236_v28 = vsub.f32 %v3398_v57, %v3563_v15  ;;  %v1138_v3 = vmul.f32 %v914_v32, %v3462_v61  ;;  %v982_v13 = vadd.f32 %v950_v31, %v886_v59 }
 0x1d5   : > { %v1078_v27 = vadd.f32 %v1046_v19, %v1014_v40  ;;  %v1141_v54 = vmul.f32 %v917_v52, %v3480_v18  ;;  %v915_v33 = vsel %vm819_vm3, %v883_v10, 2.0  ;;  %v985_v21 = vadd.f32 %v953_v6, %v889_v41 }
 0x1d6   : > { %v1081_v35 = vadd.f32 %v1049_v55, %v1017_v51  ;;  %v1202_v48 = vmul.f32 %v2673_v47, %v1138_v3  ;;  %v920_v9 = vsel %vm824_vm4, %v888_v36, 2.0  ;;  %v855_v20 = vmul.f32 2.0, %v2671_v60  ;;  %v3588_v36 = vld [vmem:[%s3876_s2] ss:$0 sm:$0xff] }
 0x1d7   : > { %v1110_v44 = vsel %vm822_vm5, %v982_v13, %v1078_v27  ;;  %v1047_v32 = vmul.f32 %v2671_v60, %v2671_v60  ;;  %v790_v46 = vmul.f32 1.442695, %v732_v8  ;;  %v1139_v1 = vmul.f32 %v915_v33, %v3486_v12 }
 0x1d8   : > { %2680 = vrcp.f32 %v1110_v44  ;;  %v1113_v57 = vsel %vm825_vm6, %v985_v21, %v1081_v35  ;;  %v887_v17 = vmul.f32 %v2671_v60, %v855_v20  ;;  %v951_v4 = vadd.f32 1.0, %v855_v20 }
 0x1d9   : > { %2682 = vrcp.f32 %v1113_v57  ;;  %v1015_v10 = vadd.f32 2.0, %v855_v20  ;;  %v2675_v63 = vpop.eup %2674  ;;  %v3592_v58 = vadd.f32 %v3588_v36, %v3364_v42  ;;  %v3596_v15 = vadd.f32 %v3588_v36, %v3370_v50 }
 0x1da   : > { %2684 = vpow2.f32 %v790_v46  ;;  %v2677_v25 = vpop.eup %2676  ;;  %v1205_v43 = vmul.f32 %v2675_v63, %v1141_v54  ;;  %v1144_v23 = vmul.f32 %v920_v9, %v3490_v0  ;;  %v983_v52 = vadd.f32 %v951_v4, %v887_v17 }
 0x1db   : > { %v1079_v26 = vadd.f32 %v1047_v32, %v1015_v10  ;;  %v1203_v62 = vmul.f32 %v2677_v25, %v1139_v1  ;;  %v918_v19 = vsel %vm822_vm5, %v886_v59, 2.0  ;;  %v921_v56 = vsel %vm825_vm6, %v889_v41, 2.0  ;;  %v3618_v41 = vld [vmem:[%s3878_s4] ss:$0 sm:$0xff] }
 0x1dc   : > { %v698_v42 = vand.u32 2147483647, %v3592_v58  ;;  %v1234_v55 = vsub.f32 %v3462_v61, %v1202_v48  ;;  %v1237_v50 = vsub.f32 %v3480_v18, %v1205_v43  ;;  %v701_v60 = vand.u32 2147483647, %v3596_v15 }
 0x1dd   : > { %v1111_v8 = vsel %vm823_vm7, %v983_v52, %v1079_v26  ;;  %v2679_v29 = vpop.eup %2678  ;;  %v1235_v31 = vsub.f32 %v3486_v12, %v1203_v62  ;;  %v3612_v40 = vadd.f32 %v3588_v36, %v3380_v2  ;;  %v1145_v61 = vmul.f32 %v921_v56, %v3516_v39 }
 0x1de   : > { %2686 = vrcp.f32 %v1111_v8  ;;  %v730_v59 = vsub.f32 0.0, %v698_v42  ;;  %v2196_v47 = vpack.c.bf16 %v1237_v50, %v1236_v28  ;;  %v733_v18 = vsub.f32 0.0, %v701_v60 }
 0x1df   : > { %v1556_v6 = vadd.f32 %v3618_v41, %v3255_v5  ;;  %v2191_v12 = vpack.c.bf16 %v1235_v31, %v1234_v55  ;;  %v919_v51 = vsel %vm823_vm7, %v887_v17, 2.0  ;;  %v699_v2 = vand.u32 2147483647, %v3612_v40 }
 0x1e0   : > { %v786_v3 = vmul.f32 1.442695, %v730_v59  ;;  %2316 = vst [vmem:[%s3355_s17 + $0x48] sm:$0xff] %v2196_v47   ;;  %v1208_v28 = vmul.f32 %v2679_v29, %v1144_v23  ;;  %v792_v13 = vmul.f32 1.442695, %v733_v18  ;;  %v1548_v27 = vadd.f32 %v3618_v41, %v3261_v11 }
 0x1e1   : > { %v1559_v54 = vadd.f32 %v3618_v41, %v3265_v16  ;;  %2315 = vst [vmem:[%s3355_s17 + $0x40] sm:$0xff] %v2191_v12   ;;  %v731_v5 = vsub.f32 0.0, %v699_v2  ;;  %v1551_v21 = vadd.f32 %v3618_v41, %v3267_v22  ;;  %v3635_v35 = vadd.f32 %v3588_v36, %v3400_v53 }
 0x1e2   : > { %v2681_v33 = vpop.eup %2680  ;;  %2688 = vpow2.f32 %v786_v3  ;;  %v1142_v9 = vmul.f32 %v918_v19, %v3510_v45  ;;  %v3640_v16 = vadd.f32 %v3588_v36, %v3404_v38  ;;  %v1240_v46 = vsub.f32 %v3490_v0, %v1208_v28 }
 0x1e3   : > { %v2683_v48 = vpop.eup %2682  ;;  %2690 = vpow2.f32 %v792_v13  ;;  %v2256_v11 = vpack.c.bf16 %v1559_v54, %v1556_v6  ;;  %v788_v57 = vmul.f32 1.442695, %v731_v5  ;;  %v2251_v32 = vpack.c.bf16 %v1551_v21, %v1548_v27 }
 0x1e4   : > { %v2685_v44 = vpop.eup %2684  ;;  %v1209_v20 = vmul.f32 %v2683_v48, %v1145_v61  ;;  %v704_v22 = vand.u32 2147483647, %v3635_v35  ;;  %v1206_v53 = vmul.f32 %v2681_v33, %v1142_v9  ;;  %v1143_v17 = vmul.f32 %v919_v51, %v3523_v49 }
 0x1e5   : > { %v860_v4 = vmul.f32 2.0, %v2685_v44  ;;  %2327 = vst [vmem:[%s3223_s16 + $0x28] sm:$0xff] %v2256_v11   ;;  %2692 = vpow2.f32 %v788_v57  ;;  %2326 = vst [vmem:[%s3223_s16 + $0x20] sm:$0xff] %v2251_v32   ;;  %v702_v63 = vand.u32 2147483647, %v3640_v16  ;;  %v1052_v23 = vmul.f32 %v2685_v44, %v2685_v44 }
 0x1e6   : > { %v1241_v10 = vsub.f32 %v3516_v39, %v1209_v20  ;;  %v736_v38 = vsub.f32 0.0, %v704_v22  ;;  %v3651_v19 = vadd.f32 %v3588_v36, %v3406_v24  ;;  %vm828_vm8 = vcmp.ge.f32.partialorder %v3551_v30, 0.0 }
 0x1e7   : > { %v892_v1 = vmul.f32 %v2685_v44, %v860_v4  ;;  %v956_v25 = vadd.f32 1.0, %v860_v4  ;;  %v1020_v43 = vadd.f32 2.0, %v860_v4  ;;  %v734_v62 = vsub.f32 0.0, %v702_v63 }
 0x1e8   : > { %v2687_v52 = vpop.eup %2686  ;;  %v2206_v26 = vpack.c.bf16 %v1241_v10, %v1240_v46  ;;  %v798_v0 = vmul.f32 1.442695, %v736_v38  ;;  %v705_v50 = vand.u32 2147483647, %v3651_v19  ;;  %v1238_v8 = vsub.f32 %v3510_v45, %v1206_v53 }
 0x1e9   : > { %v1207_v56 = vmul.f32 %v2687_v52, %v1143_v17  ;;  %v988_v39 = vadd.f32 %v956_v25, %v892_v1  ;;  %v1084_v42 = vadd.f32 %v1052_v23, %v1020_v43  ;;  %v794_v55 = vmul.f32 1.442695, %v734_v62 }
 0x1ea   : > { %2318 = vst [vmem:[%s3355_s17 + $0x58] sm:$0xff] %v2206_v26   ;;  %2694 = vpow2.f32 %v798_v0  ;;  %vm826_vm9 = vcmp.ge.f32.partialorder %v3592_v58, 0.0  ;;  %v737_v31 = vsub.f32 0.0, %v705_v50  ;;  %vm829_vm10 = vcmp.ge.f32.partialorder %v3596_v15, 0.0 }
 0x1eb   : > { %v1239_v60 = vsub.f32 %v3523_v49, %v1207_v56  ;;  %v1116_v29 = vsel %vm828_vm8, %v988_v39, %v1084_v42  ;;  %v3664_v49 = vadd.f32 %v3588_v36, %v3411_v34  ;;  %vm827_vm11 = vcmp.ge.f32.partialorder %v3612_v40, 0.0 }
 0x1ec   : > { %v2689_v24 = vpop.eup %2688  ;;  %2696 = vrcp.f32 %v1116_v29  ;;  %v800_v45 = vmul.f32 1.442695, %v737_v31  ;;  %v924_v48 = vsel %vm828_vm8, %v892_v1, 2.0  ;;  %vm832_vm12 = vcmp.ge.f32.partialorder %v3635_v35, 0.0 }
 0x1ed   : > { %v2691_v59 = vpop.eup %2690  ;;  %v2201_v47 = vpack.c.bf16 %v1239_v60, %v1238_v8  ;;  %v858_v61 = vmul.f32 2.0, %v2689_v24  ;;  %2698 = vpow2.f32 %v794_v55  ;;  %v1050_v18 = vmul.f32 %v2689_v24, %v2689_v24 }
 0x1ee   : > { %v861_v6 = vmul.f32 2.0, %v2691_v59  ;;  %v1053_v2 = vmul.f32 %v2691_v59, %v2691_v59  ;;  %2700 = vpow2.f32 %v800_v45  ;;  %v703_v9 = vand.u32 2147483647, %v3664_v49 }
 0x1ef   : > { %2317 = vst [vmem:[%s3355_s17 + $0x50] sm:$0xff] %v2201_v47   ;;  %v890_v12 = vmul.f32 %v2689_v24, %v858_v61  ;;  %v954_v51 = vadd.f32 1.0, %v858_v61  ;;  %v1018_v3 = vadd.f32 2.0, %v858_v61  ;;  %v2693_v28 = vpop.eup %2692  ;;  %v1148_v17 = vmul.f32 %v924_v48, %v3551_v30 }
 0x1f0   : > { %v893_v13 = vmul.f32 %v2691_v59, %v861_v6  ;;  %v957_v27 = vadd.f32 1.0, %v861_v6  ;;  %v1021_v54 = vadd.f32 2.0, %v861_v6  ;;  %v859_v21 = vmul.f32 2.0, %v2693_v28 }
 0x1f1   : > { %v986_v33 = vadd.f32 %v954_v51, %v890_v12  ;;  %v1082_v5 = vadd.f32 %v1050_v18, %v1018_v3  ;;  %v922_v11 = vsel %vm826_vm9, %v890_v12, 2.0  ;;  %v1051_v53 = vmul.f32 %v2693_v28, %v2693_v28  ;;  %v3912_v12 = vld [vmem:[#allocation15_spill] sm:$0xff] }
 0x1f2   : > { %v989_v34 = vadd.f32 %v957_v27, %v893_v13  ;;  %v1085_v36 = vadd.f32 %v1053_v2, %v1021_v54  ;;  %v891_v20 = vmul.f32 %v2693_v28, %v859_v21  ;;  %v955_v57 = vadd.f32 1.0, %v859_v21 }
 0x1f3   : > { %v1114_v44 = vsel %vm826_vm9, %v986_v33, %v1082_v5  ;;  %v1019_v46 = vadd.f32 2.0, %v859_v21  ;;  %v735_v1 = vsub.f32 0.0, %v703_v9  ;;  %v1572_v25 = vadd.f32 %v3618_v41, %v3286_v7  ;;  %v3913_v21 = vld [vmem:[#allocation16_spill] sm:$0xff] }
 0x1f4   : > { %v2695_v32 = vpop.eup %2694  ;;  %2702 = vrcp.f32 %v1114_v44  ;;  %v1117_v22 = vsel %vm829_vm10, %v989_v34, %v1085_v36  ;;  %v987_v4 = vadd.f32 %v955_v57, %v891_v20  ;;  %v1564_v43 = vadd.f32 %v3618_v41, %v3292_v14 }
 0x1f5   : > { %2704 = vrcp.f32 %v1117_v22  ;;  %v864_v10 = vmul.f32 2.0, %v2695_v32  ;;  %v1083_v63 = vadd.f32 %v1051_v53, %v1019_v46  ;;  %v1146_v52 = vmul.f32 %v922_v11, %v3592_v58  ;;  %v3914_v53 = vld [vmem:[#allocation17_spill] sm:$0xff] }
 0x1f6   : > { %v2697_v38 = vpop.eup %2696  ;;  %v1056_v39 = vmul.f32 %v2695_v32, %v2695_v32  ;;  %vm830_vm13 = vcmp.ge.f32.partialorder %v3640_v16, 0.0  ;;  %vm833_vm14 = vcmp.ge.f32.partialorder %v3651_v19, 0.0  ;;  %v796_v55 = vmul.f32 1.442695, %v735_v1  ;;  %v3916_v1 = vld [vmem:[#allocation19_spill] sm:$0xff] }
 0x1f7   : > { %v2699_v23 = vpop.eup %2698  ;;  %v896_v26 = vmul.f32 %v2695_v32, %v864_v10  ;;  %v960_v0 = vadd.f32 1.0, %v864_v10  ;;  %v1024_v62 = vadd.f32 2.0, %v864_v10  ;;  %v1115_v56 = vsel %vm827_vm11, %v987_v4, %v1083_v63 }
 0x1f8   : > { %v862_v42 = vmul.f32 2.0, %v2699_v23  ;;  %v925_v7 = vsel %vm829_vm10, %v893_v13, 2.0  ;;  %v923_v14 = vsel %vm827_vm11, %v891_v20, 2.0  ;;  %2706 = vrcp.f32 %v1115_v56  ;;  %v2701_v8 = vpop.eup %2700 }
 0x1f9   : > { %v992_v50 = vadd.f32 %v960_v0, %v896_v26  ;;  %v1212_v60 = vmul.f32 %v2697_v38, %v1148_v17  ;;  %v1088_v29 = vadd.f32 %v1056_v39, %v1024_v62  ;;  %v1054_v47 = vmul.f32 %v2699_v23, %v2699_v23  ;;  %v3915_v38 = vld [vmem:[#allocation18_spill] sm:$0xff] }
 0x1fa   : > { %v3692_v24 = vmul.f32 %v2699_v23, %v862_v42  ;;  %v958_v31 = vadd.f32 1.0, %v862_v42  ;;  %v1022_v59 = vadd.f32 2.0, %v862_v42  ;;  %v865_v61 = vmul.f32 2.0, %v2701_v8  ;;  %v3917_v23 = vld [vmem:[#allocation20_spill] sm:$0xff] }
 0x1fb   : > { %2708 = vpow2.f32 %v796_v55  ;;  %v1149_v18 = vmul.f32 %v925_v7, %v3596_v15  ;;  %v1147_v6 = vmul.f32 %v923_v14, %v3612_v40  ;;  %v1120_v45 = vsel %vm832_vm12, %v992_v50, %v1088_v29  ;;  %v3920_v14 = vld [vmem:[#allocation23_spill] sm:$0xff]  ;;  %v3922_v29 = vld [vmem:[#allocation25_spill] sm:$0xff] }
 0x1fc   : > { %v1575_v51 = vadd.f32 %v3618_v41, %v3912_v12  ;;  %v990_v3 = vadd.f32 %v958_v31, %v3692_v24  ;;  %v1086_v2 = vadd.f32 %v1054_v47, %v1022_v59  ;;  %v897_v28 = vmul.f32 %v2701_v8, %v865_v61 }
 0x1fd   : > { %v1057_v13 = vmul.f32 %v2701_v8, %v2701_v8  ;;  %v961_v54 = vadd.f32 1.0, %v865_v61  ;;  %v1025_v33 = vadd.f32 2.0, %v865_v61  ;;  %v1567_v48 = vadd.f32 %v3618_v41, %v3913_v21  ;;  %v3921_v8 = vld [vmem:[#allocation24_spill] sm:$0xff] }
 0x1fe   : > { %v2703_v27 = vpop.eup %2702  ;;  %v2266_v5 = vpack.c.bf16 %v1575_v51, %v1572_v25  ;;  %v1244_v36 = vsub.f32 %v3551_v30, %v1212_v60  ;;  %v928_v11 = vsel %vm832_vm12, %v896_v26, 2.0  ;;  %2710 = vrcp.f32 %v1120_v45  ;;  %v3919_v26 = vld [vmem:[#allocation22_spill] sm:$0xff]  ;;  %v3924_v51 = vld [vmem:[#allocation27_spill] sm:$0xff] }
 0x1ff   : > { %v2705_v34 = vpop.eup %2704  ;;  %v1210_v9 = vmul.f32 %v2703_v27, %v1146_v52  ;;  %v993_v20 = vadd.f32 %v961_v54, %v897_v28  ;;  %v1089_v57 = vadd.f32 %v1057_v13, %v1025_v33  ;;  %v1588_v32 = vadd.f32 %v3618_v41, %v3326_v37  ;;  %v3918_v52 = vld [vmem:[#allocation21_spill] sm:$0xff] }
 0x200   : > { %v1213_v44 = vmul.f32 %v2705_v34, %v1149_v18  ;;  %2329 = vst [vmem:[%s3223_s16 + $0x38] sm:$0xff] %v2266_v5   ;;  %v1118_v22 = vsel %vm830_vm13, %v990_v3, %v1086_v2  ;;  %v929_v46 = vsel %vm833_vm14, %v897_v28, 2.0  ;;  %v2261_v30 = vpack.c.bf16 %v1567_v48, %v1564_v43  ;;  %v3923_v18 = vld [vmem:[#allocation26_spill] sm:$0xff]  ;;  %v3926_v27 = vld [vmem:[#allocation29_spill] sm:$0xff] }
 0x201   : > { %v1580_v17 = vadd.f32 %v3618_v41, %v3914_v53  ;;  %v1121_v10 = vsel %vm833_vm14, %v993_v20, %v1089_v57  ;;  %v1591_v63 = vadd.f32 %v3618_v41, %v3915_v38  ;;  %v1583_v37 = vadd.f32 %v3618_v41, %v3916_v1  ;;  %v3927_v34 = vld [vmem:[#allocation30_spill] sm:$0xff]  ;;  %v3928_v20 = vld [vmem:[#allocation31_spill] sm:$0xff] }
 0x202   : > { %v1245_v4 = vsub.f32 %v3596_v15, %v1213_v44  ;;  %v2707_v25 = vpop.eup %2706  ;;  %2712 = vrcp.f32 %v1121_v10  ;;  %2328 = vst [vmem:[%s3223_s16 + $0x30] sm:$0xff] %v2261_v30   ;;  %v1604_v43 = vadd.f32 %v3618_v41, %v3917_v23  ;;  %v1596_v15 = vadd.f32 %v3618_v41, %v3918_v52 }
 0x203   : > { %v1607_v0 = vadd.f32 %v3618_v41, %v3919_v26  ;;  %v1211_v56 = vmul.f32 %v2707_v25, %v1147_v6  ;;  %v2276_v39 = vpack.c.bf16 %v1591_v63, %v1588_v32  ;;  %v2271_v42 = vpack.c.bf16 %v1583_v37, %v1580_v17 }
 0x204   : > { %v2216_v62 = vpack.c.bf16 %v1245_v4, %v1244_v36  ;;  %v1599_v50 = vadd.f32 %v3618_v41, %v3920_v14  ;;  %v1620_v60 = vadd.f32 %v3618_v41, %v3921_v8  ;;  %v1612_v31 = vadd.f32 %v3618_v41, %v3922_v29 }
 0x205   : > { %v2709_v55 = vpop.eup %2708  ;;  %v2286_v7 = vpack.c.bf16 %v1607_v0, %v1604_v43  ;;  %v1242_v59 = vsub.f32 %v3592_v58, %v1210_v9  ;;  %v1243_v47 = vsub.f32 %v3612_v40, %v1211_v56  ;;  %2331 = vst [vmem:[%s3223_s16 + $0x48] sm:$0xff] %v2276_v39   ;;  %2330 = vst [vmem:[%s3223_s16 + $0x40] sm:$0xff] %v2271_v42   ;;  %v3925_v58 = vld [vmem:[#allocation28_spill] sm:$0xff]  ;;  %2714 = vrcp.f32 %v1118_v22 }
 0x206   : > { %2320 = vst [vmem:[%s3355_s17 + $0x68] sm:$0xff] %v2216_v62   ;;  %v863_v61 = vmul.f32 2.0, %v2709_v55  ;;  %v1623_v6 = vadd.f32 %v3618_v41, %v3923_v18  ;;  %v1055_v45 = vmul.f32 %v2709_v55, %v2709_v55  ;;  %v2281_v12 = vpack.c.bf16 %v1599_v50, %v1596_v15 }
 0x207   : > { %2333 = vst [vmem:[%s3223_s16 + $0x58] sm:$0xff] %v2286_v7   ;;  %v1615_v3 = vadd.f32 %v3618_v41, %v3924_v51  ;;  %v1636_v2 = vadd.f32 %v3618_v41, %v3925_v58  ;;  %v2211_v40 = vpack.c.bf16 %v1243_v47, %v1242_v59  ;;  %v1628_v54 = vadd.f32 %v3618_v41, %v3926_v27 }
 0x208   : > { %v3747_v28 = vmul.f32 %v2709_v55, %v863_v61  ;;  %v959_v13 = vadd.f32 1.0, %v863_v61  ;;  %v2711_v33 = vpop.eup %2710  ;;  %v1023_v5 = vadd.f32 2.0, %v863_v61  ;;  %2332 = vst [vmem:[%s3223_s16 + $0x50] sm:$0xff] %v2281_v12   ;;  %v2296_v21 = vpack.c.bf16 %v1623_v6, %v1620_v60 }
 0x209   : > { %v2291_v48 = vpack.c.bf16 %v1615_v3, %v1612_v31  ;;  %v1639_v36 = vadd.f32 %v3618_v41, %v3927_v34  ;;  %2319 = vst [vmem:[%s3355_s17 + $0x60] sm:$0xff] %v2211_v40   ;;  %v1152_v9 = vmul.f32 %v928_v11, %v3635_v35  ;;  %v1631_v57 = vadd.f32 %v3618_v41, %v3928_v20 }
 0x20a   : > { %v991_v44 = vadd.f32 %v959_v13, %v3747_v28  ;;  %v1087_v32 = vadd.f32 %v1055_v45, %v1023_v5  ;;  %2335 = vst [vmem:[%s3223_s16 + $0x68] sm:$0xff] %v2296_v21   ;;  %v1153_v17 = vmul.f32 %v929_v46, %v3651_v19  ;;  %vm831_vm15 = vcmp.ge.f32.partialorder %v3664_v49, 0.0 }
 0x20b   : > { %2334 = vst [vmem:[%s3223_s16 + $0x60] sm:$0xff] %v2291_v48   ;;  %v2306_v30 = vpack.c.bf16 %v1639_v36, %v1636_v2  ;;  %v1216_v53 = vmul.f32 %v2711_v33, %v1152_v9  ;;  %v2301_v11 = vpack.c.bf16 %v1631_v57, %v1628_v54 }
 0x20c   : > { %v2713_v41 = vpop.eup %2712  ;;  %v1119_v22 = vsel %vm831_vm15, %v991_v44, %v1087_v32 }
 0x20d   : > { %2337 = vst [vmem:[%s3223_s16 + $0x78] sm:$0xff] %v2306_v30   ;;  %v1217_v46 = vmul.f32 %v2713_v41, %v1153_v17  ;;  %2716 = vrcp.f32 %v1119_v22  ;;  %2336 = vst [vmem:[%s3223_s16 + $0x70] sm:$0xff] %v2301_v11  }
 0x20e   : > { %2819 = shalt.err (!%p2816_p1)
}
 0x20f   : > { %s2820_s16 = scalar_lea.hbm %s3770_s27, 2048  ;;  %s2824_s18 = scalar_lea.hbm %s3880_s6, 4096 }
 0x210   : > { %p2821_p13 = scmp.ne.s32.totalorder %s3770_s27, %s2820_s16  ;;  %p2825_p4 = scmp.lt.u32.totalorder %s3770_s27, %s3880_s6 }
 0x211   : > { %p2826_p5 = scmp.lt.u32.totalorder %s2824_s18, %s2820_s16  ;;  %p2828_p11 = scmp.lt.u32.totalorder %s2820_s16, %s3770_s27 }
 0x212   : > { %p2822_p6 = pnand %p2821_p13, %p3929_p0 }
 0x213   : > { %p2827_p8 = por %p2826_p5, %p2825_p4 }
 0x214   : > { %p2823_p10 = pneg %p2822_p6 }
 0x215   : > { %p2829_p2 = por %p2828_p11, %p2827_p8 }
 0x217   : > { %p2830_p3 = pnand %p2829_p2, %p2823_p10 }
 0x219   : > { %2833 = shalt.err (!%p2830_p3)
}
 0x21a   : > { %s2916_s19 = smov 64   ;;  %s2917_s26 = smov 4   ;;  %v1248_v4 = vsub.f32 %v3635_v35, %v1216_v53  ;;  %v1249_v10 = vsub.f32 %v3651_v19, %v1217_v46  ;;  %v926_v38 = vsel %vm830_vm13, %v3692_v24, 2.0  ;;  %v2715_v1 = vpop.eup %2714  ;;  %v927_v37 = vsel %vm831_vm15, %v3747_v28, 2.0 }
 0x21b   : > { %2493 = dma.vmem_to_hbm [thread:$0]  (%p3929_p0), %s3772_s14, 2048, %s3770_s27, %s1808_s29, %s2916_s19, %s2916_s19, %s2917_s26   ;;  %v1150_v25 = vmul.f32 %v926_v38, %v3640_v16  ;;  %v1151_v23 = vmul.f32 %v927_v37, %v3664_v49  ;;  %v2717_v19 = vpop.eup %2716 }
 0x21c   : > { %v2226_v63 = vpack.c.bf16 %v1249_v10, %v1248_v4  ;;  %s1821_s14 = sshll.u32 %s3355_s17, 4  ;;  %s3824_s12 = scalar_lea.hbm %s3879_s5, %s2146_s15  ;;  %s3826_s14 = int_to_ptr.vmem [resolvable:$true] %s1821_s14 }
 0x21d   : > { %v1214_v35 = vmul.f32 %v2715_v1, %v1150_v25  ;;  %v1215_v43 = vmul.f32 %v2717_v19, %v1151_v23  ;;  %s1803_s16 = scalar_lea.sflag [#allocation4], %s3135_s30  ;;  %s2834_s13 = scalar_lea.vmem %s3826_s14, 2048 }
 0x21e   : > { %2322 = vst [vmem:[%s3355_s17 + $0x78] sm:$0xff] %v2226_v63   ;;  %p2835_p7 = scmp.ne.s32.totalorder %s3826_s14, %s2834_s13  ;;  %s2918_s10 = smov [#allocation8]  }
 0x21f   : > { %v1246_v24 = vsub.f32 %v3640_v16, %v1214_v35  ;;  %v1247_v52 = vsub.f32 %v3664_v49, %v1215_v43  ;;  %s2838_s18 = sshll.u32 %s2918_s10, 4  ;;  %s2839_s18 = int_to_ptr.vmem [resolvable:$false] %s2838_s18 }
 0x220   : > { %p2836_p9 = pnand %p2835_p7, %p3929_p0  ;;  %s2840_s25 = scalar_lea.vmem %s2839_s18, 4096 }
 0x221   : > { %v2221_v15 = vpack.c.bf16 %v1247_v52, %v1246_v24  ;;  %p2841_p1 = scmp.lt.s32.totalorder %s3826_s14, %s2839_s18  ;;  %p2842_p13 = scmp.lt.s32.totalorder %s2840_s25, %s2834_s13 }
 0x222   : > { %p2837_p12 = pneg %p2836_p9 }
 0x223   : > { %2321 = vst [vmem:[%s3355_s17 + $0x70] sm:$0xff] %v2221_v15   ;;  %p2843_p6 = por %p2842_p13, %p2841_p1 }
 0x225   : > { %p2844_p10 = pnand %p2843_p6, %p2837_p12 }
 0x227   : > { %2847 = shalt.err (!%p2844_p10)
}
 0x228   : > { %s2848_s17 = scalar_lea.hbm %s3824_s12, 2048  ;;  %s2852_s20 = scalar_lea.hbm %s3879_s5, 4096 }
 0x229   : > { %p2849_p4 = scmp.ne.s32.totalorder %s3824_s12, %s2848_s17  ;;  %p2853_p11 = scmp.lt.u32.totalorder %s3824_s12, %s3879_s5 }
 0x22a   : > { %p2854_p2 = scmp.lt.u32.totalorder %s2852_s20, %s2848_s17  ;;  %p2856_p7 = scmp.lt.u32.totalorder %s2848_s17, %s3824_s12 }
 0x22b   : > { %p2850_p5 = pnand %p2849_p4, %p3929_p0 }
 0x22c   : > { %p2855_p3 = por %p2854_p2, %p2853_p11 }
 0x22d   : > { %p2851_p8 = pneg %p2850_p5 }
 0x22e   : > { %p2857_p9 = por %p2856_p7, %p2855_p3 }
 0x230   : > { %p2858_p12 = pnand %p2857_p9, %p2851_p8 }
 0x232   : > { %2861 = shalt.err (!%p2858_p12)
}
 0x233   : > { %2492 = dma.vmem_to_hbm [thread:$0]  (%p3929_p0), %s3826_s14, 2048, %s3824_s12, %s1803_s16, %s2916_s19, %s2916_s19, %s2917_s26  }
 0x234 PF: > { %s1852_s13 = sand.u32 1, %s2896_s21   ;;  %p3930_p1 = scmp.ne.s32.totalorder %s3885_s28, 0 }
 0x235   : > { %p3931_p13 = scmp.ge.s32.totalorder %s2908_s24, 2  ;;  %s1853_s10 = scalar_lea.sflag [#allocation4], %s1852_s13 }
 0x237   : > { %p2508_p6 = pnand %p3931_p13, %p3930_p1 }
 0x239   : > { %2887 = dma.done.wait (!%p2508_p6), %s1853_s10, 2048  }
 0x23a   : > { %2889 = vsyncadd (!%p2508_p6), %s1853_s10, 4294965248  ;;  %s1862_s9 = scalar_lea.sflag [#allocation10], %s1852_s13 }
 0x23b   : > { %2891 = dma.done.wait (!%p2508_p6), %s1862_s9, 2048  }
 0x23c   : > { %2893 = vsyncadd (!%p2508_p6), %s1862_s9, 4294965248  ;;  %p24_p0 = scmp.ge.s32.totalorder %s3070_s8, 4   ;;  %s3932_s21 = smov %s2900_s22 }
 0x23d   : > { %s3933_s22 = smov %s2904_s23  ;;  %s3934_s23 = smov %s3086_s11 }
 0x23e   : > { %s3935_s24 = smov %s3070_s8  ;;  %26 = sbr.rel (!%p24_p0) target bundleno = 8 (0x8), region = 110 }
 0x245   :  { %1867 = vsyncpa [#allocation3], 1 }
 0x246   :  { %1869 = vsyncpa [#allocation3 + $0x1], 1 }
 0x247   :  { %1870 = vsyncpa [#allocation6], 1 }
 0x248   :  { %1871 = vsyncpa [#allocation4], 1 }
 0x249   :  { %1873 = vsyncpa [#allocation4 + $0x1], 1 }
 0x24a   :  { %1874 = vsyncpa [#allocation10], 1 }
 0x24b   :  { %1876 = vsyncpa [#allocation10 + $0x1], 1 }

</bundles_post_ra>
